<compile_context>
chip_gen: v7x
topology: tpu7x:2x2x1
jax: 0.10.0
libtpu: 0.0.40
codegen_flags: <defaults>
</compile_context>

<pallas_src>
import functools

import jax
import jax.numpy as jnp
from jax.experimental import pallas as pl
from jax.experimental.pallas import tpu as pltpu

NEG_SLOPE = 0.2          # GATv2Conv default negative_slope
_MASK_SCALE = 1e30       # additive-mask magnitude for non-edges
_FUSED_MAX_N = 256       # above this the whole-resident slab stops fitting v7x VMEM


# ----------------------------------------------------------------------------
# Per-generation knobs
# ----------------------------------------------------------------------------
def _device_kind():
    try:
        return jax.devices()[0].device_kind.lower()
    except Exception:
        return ""


def _elementwise_dtype():
    """bf16 elementwise score path on bf16-native VPUs (v6e/v7x); f32 on <=v5."""
    kind = _device_kind()
    if any(s in kind for s in ("v2", "v3", "v4", "v5")):
        return jnp.float32
    return jnp.bfloat16


def _vmem_limit_bytes():
    kind = _device_kind()
    if "v7" in kind:
        return 48 * 1024 * 1024       # 64 MiB physical on v7x -> leave headroom
    if "v5" in kind or "v6" in kind:
        return 96 * 1024 * 1024       # 128 MiB physical
    return 48 * 1024 * 1024


def _pick_tile(n, f_max):
    """Target-row tile for the tiled path, sized so the (TI, F, N) slab fits."""
    item = jnp.dtype(_elementwise_dtype()).itemsize
    budget = _vmem_limit_bytes() // 3                 # slab + buffers + headroom
    ti = budget // max(1, f_max * n * item)
    ti = int(min(256, max(32, (ti // 32) * 32)))      # multiple of 32 (int8 adj sublanes)
    return ti


# ----------------------------------------------------------------------------
# Shared per-layer math (runs inside the kernels)
# ----------------------------------------------------------------------------
def _gatv2_layer(x_tgt, x_src, mask_bias, wlr, blr, att_col, bias, f_out,
                 ew_dtype, fused_proj):
    """One GATv2Conv + Identity norm + ReLU for a block of target nodes.

    x_tgt: (Nt, Fin) target-node features, x_src: (Ns, Fin) source-node features,
    mask_bias: (Nt, Ns) additive mask (0 for edge incl. self-loop, -1e30 otherwise),
    wlr: (Fin, 2*Fout) = [W_l | W_r], blr: (1, 2*Fout), att_col: (Fout, 1),
    bias: (1, Fout).  Returns (Nt, Fout) float32.
    """
    if fused_proj:
        # x_src is x_tgt: one wider MXU matmul, then split.
        xlr = jnp.dot(x_src, wlr, preferred_element_type=jnp.float32) + blr
        xl = xlr[:, :f_out]                                   # (Ns, Fout)  source proj
        xr = xlr[:, f_out:]                                   # (Nt, Fout)  target proj
    else:
        xl = jnp.dot(x_src, wlr[:, :f_out],
                     preferred_element_type=jnp.float32) + blr[:, :f_out]
        xr = jnp.dot(x_tgt, wlr[:, f_out:],
                     preferred_element_type=jnp.float32) + blr[:, f_out:]

    # (target, F, source) layout: large source axis on lanes, F on sublanes.
    xl_t = xl.T.astype(ew_dtype)                              # (Fout, Ns)
    z = xr.astype(ew_dtype)[:, :, None] + xl_t[None, :, :]    # (Nt, Fout, Ns)
    e = jnp.maximum(z, jnp.asarray(NEG_SLOPE, ew_dtype) * z)  # leaky_relu via max
    att_b = att_col.astype(ew_dtype)[None, :, :]              # (1, Fout, 1)
    # att-weighted F reduction: sublane reduce, f32 accumulation.
    score = jnp.sum(e * att_b, axis=1, dtype=jnp.float32)     # (Nt, Ns)

    # Masked softmax over incoming edges (source axis = lanes); mask/max in f32.
    score = score + mask_bias
    m = jnp.max(score, axis=-1, keepdims=True)
    p = jnp.exp((score - m).astype(ew_dtype))                 # masked entries -> exactly 0
    denom = jnp.sum(p, axis=-1, keepdims=True, dtype=jnp.float32)
    alpha = (p.astype(jnp.float32)
             * pl.reciprocal(denom, approx=True)).astype(jnp.bfloat16)

    # Aggregate messages on the MXU (bf16 in, f32 acc), + bias; Identity norm; ReLU.
    out = jnp.dot(alpha, xl.astype(jnp.bfloat16),
                  preferred_element_type=jnp.float32) + bias
    return jnp.maximum(out, 0.0)


def _adj_to_mask_bias(adj_i8):
    # 1 -> 0.0 (edge / self-loop), 0 -> -1e30 : one convert + sub + mul.
    return (adj_i8.astype(jnp.float32) - 1.0) * _MASK_SCALE


# ----------------------------------------------------------------------------
# Kernel 1: whole-resident fused forward (small graphs)
# ----------------------------------------------------------------------------
def _fused_gatv2_kernel(num_layers, f_outs, ew_dtype, *refs):
    # refs = (x, adj, [wlr, blr, att, bias] * L, w_out, b_out, out)
    x_ref, adj_ref = refs[0], refs[1]
    w_out_ref, b_out_ref = refs[-3], refs[-2]
    out_ref = refs[-1]
    layer_refs = refs[2:2 + 4 * num_layers]

    x = x_ref[...]
    mask_bias = _adj_to_mask_bias(adj_ref[...])      # built once, reused by both layers

    for l in range(num_layers):
        wlr, blr, att, bias = layer_refs[4 * l:4 * l + 4]
        x = _gatv2_layer(x, x, mask_bias, wlr[...], blr[...], att[...], bias[...],
                         f_outs[l], ew_dtype, fused_proj=True)

    # Final Linear + exact softmax along dim=1 (class axis).
    logits = jnp.dot(x, w_out_ref[...], preferred_element_type=jnp.float32) + b_out_ref[...]
    m = jnp.max(logits, axis=1, keepdims=True)
    p = jnp.exp(logits - m)
    out_ref[...] = p / jnp.sum(p, axis=1, keepdims=True)


def _forward_fused(params, x, adj):
    num_layers = len(params["gat"])
    n = x.shape[0]
    out_dim = params["out"]["w"].shape[1]
    f_outs = tuple(lp["wl"].shape[1] for lp in params["gat"])
    ew = _elementwise_dtype()

    args = [x, adj]
    for lp in params["gat"]:
        wlr = jnp.concatenate([lp["wl"], lp["wr"]], axis=1)       # (Fin, 2*Fout)
        blr = jnp.concatenate([lp["bl"], lp["br"]], axis=1)       # (1, 2*Fout)
        args.extend([wlr, blr, lp["att"].T, lp["bias"]])          # att -> (Fout, 1)
    args.extend([params["out"]["w"], params["out"]["b"]])

    vmem_spec = pl.BlockSpec(memory_space=pltpu.MemorySpace.VMEM)
    kernel = functools.partial(_fused_gatv2_kernel, num_layers, f_outs, ew)
    return pl.pallas_call(
        kernel,
        out_shape=jax.ShapeDtypeStruct((n, out_dim), jnp.float32),
        in_specs=[vmem_spec] * len(args),
        out_specs=vmem_spec,
        compiler_params=pltpu.CompilerParams(vmem_limit_bytes=_vmem_limit_bytes()),
    )(*args)


# ----------------------------------------------------------------------------
# Kernel 2: target-tiled per-layer path (large graphs, megacore-parallel)
# ----------------------------------------------------------------------------
def _gatv2_layer_tiled_kernel(f_out, ew_dtype, x_tgt_ref, x_src_ref, adj_ref,
                              wlr_ref, blr_ref, att_ref, bias_ref, out_ref):
    mask_bias = _adj_to_mask_bias(adj_ref[...])
    out_ref[...] = _gatv2_layer(
        x_tgt_ref[...], x_src_ref[...], mask_bias,
        wlr_ref[...], blr_ref[...], att_ref[...], bias_ref[...],
        f_out, ew_dtype, fused_proj=False)


def _gatv2_layer_tiled(x, adj, wlr, blr, att_col, bias, f_out, ew_dtype, tile):
    n, f_in = x.shape
    kernel = functools.partial(_gatv2_layer_tiled_kernel, f_out, ew_dtype)
    return pl.pallas_call(
        kernel,
        out_shape=jax.ShapeDtypeStruct((n, f_out), jnp.float32),
        grid=(pl.cdiv(n, tile),),
        in_specs=[
            pl.BlockSpec((tile, f_in), lambda i: (i, 0)),          # target rows
            pl.BlockSpec((n, f_in), lambda i: (0, 0)),             # all source rows (resident)
            pl.BlockSpec((tile, n), lambda i: (i, 0)),             # int8 adjacency rows
            pl.BlockSpec((f_in, 2 * f_out), lambda i: (0, 0)),
            pl.BlockSpec((1, 2 * f_out), lambda i: (0, 0)),
            pl.BlockSpec((f_out, 1), lambda i: (0, 0)),
            pl.BlockSpec((1, f_out), lambda i: (0, 0)),
        ],
        out_specs=pl.BlockSpec((tile, f_out), lambda i: (i, 0)),
        compiler_params=pltpu.CompilerParams(
            dimension_semantics=("parallel",),
            vmem_limit_bytes=_vmem_limit_bytes()),
    )(x, x, adj, wlr, blr, att_col, bias)


def _output_softmax_kernel(x_ref, w_ref, b_ref, out_ref):
    logits = jnp.dot(x_ref[...], w_ref[...], preferred_element_type=jnp.float32) + b_ref[...]
    m = jnp.max(logits, axis=1, keepdims=True)
    p = jnp.exp(logits - m)
    out_ref[...] = p / jnp.sum(p, axis=1, keepdims=True)       # exact division


def _output_layer_tiled(x, w, b, tile):
    n, hid = x.shape
    out_dim = w.shape[1]
    return pl.pallas_call(
        _output_softmax_kernel,
        out_shape=jax.ShapeDtypeStruct((n, out_dim), jnp.float32),
        grid=(pl.cdiv(n, tile),),
        in_specs=[pl.BlockSpec((tile, hid), lambda i: (i, 0)),
                  pl.BlockSpec((hid, out_dim), lambda i: (0, 0)),
                  pl.BlockSpec((1, out_dim), lambda i: (0, 0))],
        out_specs=pl.BlockSpec((tile, out_dim), lambda i: (i, 0)),
        compiler_params=pltpu.CompilerParams(
            dimension_semantics=("parallel",),
            vmem_limit_bytes=_vmem_limit_bytes()),
    )(x, w, b)


def _forward_tiled(params, x, adj, tile):
    ew = _elementwise_dtype()
    h = x
    for lp in params["gat"]:
        f_out = lp["wl"].shape[1]
        wlr = jnp.concatenate([lp["wl"], lp["wr"]], axis=1)
        blr = jnp.concatenate([lp["bl"], lp["br"]], axis=1)
        h = _gatv2_layer_tiled(h, adj, wlr, blr, lp["att"].T, lp["bias"],
                               f_out, ew, tile)
    return _output_layer_tiled(h, params["out"]["w"], params["out"]["b"], tile)


# ----------------------------------------------------------------------------
# Public forward + graph / parameter helpers
# ----------------------------------------------------------------------------
@functools.partial(jax.jit, static_argnames=("tile",))
def gatv2_forward(params, x, adj, tile=None):
    """Full GATv2 forward. adj: dense int8 adjacency with self-loops,
    adj[target, source] = 1 for an edge (build once per graph)."""
    n = x.shape[0]
    if tile is None and n <= _FUSED_MAX_N:
        return _forward_fused(params, x, adj)
    if tile is None:
        tile = _pick_tile(n, max(lp["wl"].shape[1] for lp in params["gat"]))
    return _forward_tiled(params, x, adj, tile)


def edge_index_to_adjacency(edge_index, num_nodes):
    """int8 adjacency with self loops (add_self_loops=True); built once per graph."""
    src, dst = edge_index[0], edge_index[1]
    adj = jnp.zeros((num_nodes, num_nodes), jnp.int8)
    adj = adj.at[dst, src].set(1)
    idx = jnp.arange(num_nodes)
    adj = adj.at[idx, idx].set(1)
    return adj


def init_gatv2_params(key, input_dim, hidden_dims, output_dim):
    """Deterministic synthetic parameters (shapes mirror GATv2Conv, heads=1)."""
    params = {"gat": [], "out": None}
    dims = [input_dim] + list(hidden_dims)
    for i in range(len(hidden_dims)):
        f_in, f_out = dims[i], dims[i + 1]
        key, k1, k2, k3 = jax.random.split(key, 4)
        scale = 1.0 / jnp.sqrt(f_in)
        params["gat"].append({
            "wl": jax.random.normal(k1, (f_in, f_out), jnp.float32) * scale,
            "bl": jnp.zeros((1, f_out), jnp.float32),
            "wr": jax.random.normal(k2, (f_in, f_out), jnp.float32) * scale,
            "br": jnp.zeros((1, f_out), jnp.float32),
            "att": jax.random.normal(k3, (1, f_out), jnp.float32) * (1.0 / jnp.sqrt(f_out)),
            "bias": jnp.zeros((1, f_out), jnp.float32),
        })
    key, k1 = jax.random.split(key)
    params["out"] = {
        "w": jax.random.normal(k1, (hidden_dims[-1], output_dim), jnp.float32)
             * (1.0 / jnp.sqrt(hidden_dims[-1])),
        "b": jnp.zeros((1, output_dim), jnp.float32),
    }
    return params


# ----------------------------------------------------------------------------
# Demo
# ----------------------------------------------------------------------------
if __name__ == "__main__":
    INPUT_DIM, HIDDEN_DIMS, OUTPUT_DIM = 8, [32, 32], 4

    key = jax.random.PRNGKey(0)
    key, kx1, kx2, kp = jax.random.split(key, 4)
    params = init_gatv2_params(kp, INPUT_DIM, HIDDEN_DIMS, OUTPUT_DIM)

    def ring_edges(n):
        nodes = jnp.arange(n, dtype=jnp.int32)
        src = jnp.concatenate([nodes, (nodes + 1) % n])
        dst = jnp.concatenate([(nodes + 1) % n, nodes])
        return jnp.stack([src, dst], axis=0)       # (2, 2n): row0=source, row1=target

    # Small graph -> fully fused single pallas_call.
    N1 = 16
    x1 = jax.random.normal(kx1, (N1, INPUT_DIM), jnp.float32)
    adj1 = edge_index_to_adjacency(ring_edges(N1), N1)          # built once per graph
    out1 = jax.block_until_ready(gatv2_forward(params, x1, adj1))
    assert out1.shape == (N1, OUTPUT_DIM)
    assert jnp.allclose(jnp.sum(out1, axis=1), 1.0, atol=1e-5)

    # Larger graph -> exercise the target-tiled, megacore-parallel path and
    # cross-check it against the fused path.
    N2 = 128
    x2 = jax.random.normal(kx2, (N2, INPUT_DIM), jnp.float32)
    adj2 = edge_index_to_adjacency(ring_edges(N2), N2)
    out_tiled = jax.block_until_ready(gatv2_forward(params, x2, adj2, tile=32))
    out_fused = jax.block_until_ready(gatv2_forward(params, x2, adj2))
    assert out_tiled.shape == (N2, OUTPUT_DIM)
    assert jnp.allclose(jnp.sum(out_tiled, axis=1), 1.0, atol=1e-5)
    assert jnp.allclose(out_tiled, out_fused, atol=1e-3, rtol=1e-3)

    print("KERNEL_OK")
</pallas_src>

<mosaic_0001>
module attributes {stable_mosaic.version = 11 : i64} {
  func.func @_fused_gatv2_kernel(%arg0: memref<16x8xf32, #tpu.memory_space<vmem>>, %arg1: memref<16x16xi8, #tpu.memory_space<vmem>>, %arg2: memref<8x64xf32, #tpu.memory_space<vmem>>, %arg3: memref<1x64xf32, #tpu.memory_space<vmem>>, %arg4: memref<32x1xf32, #tpu.memory_space<vmem>>, %arg5: memref<1x32xf32, #tpu.memory_space<vmem>>, %arg6: memref<32x64xf32, #tpu.memory_space<vmem>>, %arg7: memref<1x64xf32, #tpu.memory_space<vmem>>, %arg8: memref<32x1xf32, #tpu.memory_space<vmem>>, %arg9: memref<1x32xf32, #tpu.memory_space<vmem>>, %arg10: memref<32x4xf32, #tpu.memory_space<vmem>>, %arg11: memref<1x4xf32, #tpu.memory_space<vmem>>, %arg12: memref<16x4xf32, #tpu.memory_space<vmem>>) attributes {dimension_semantics = [], scalar_prefetch = 0 : i64, scratch_operands = 0 : i64, tpu.core_type = #tpu.core_type<tc>} {
    %c0 = arith.constant 0 : index
    %c0_0 = arith.constant 0 : index
    %0 = vector.load %arg0[%c0, %c0_0] : memref<16x8xf32, #tpu.memory_space<vmem>>, vector<16x8xf32>
    %c0_1 = arith.constant 0 : index
    %c0_2 = arith.constant 0 : index
    %1 = vector.load %arg1[%c0_1, %c0_2] : memref<16x16xi8, #tpu.memory_space<vmem>>, vector<16x16xi8>
    %2 = arith.sitofp %1 : vector<16x16xi8> to vector<16x16xf32>
    %cst = arith.constant 1.000000e+00 : f32
    %3 = vector.broadcast %cst : f32 to vector<16x16xf32>
    %4 = arith.subf %2, %3 : vector<16x16xf32>
    %cst_3 = arith.constant 1.000000e+30 : f32
    %5 = vector.broadcast %cst_3 : f32 to vector<16x16xf32>
    %6 = arith.mulf %4, %5 : vector<16x16xf32>
    %c0_4 = arith.constant 0 : index
    %c0_5 = arith.constant 0 : index
    %7 = vector.load %arg2[%c0_4, %c0_5] : memref<8x64xf32, #tpu.memory_space<vmem>>, vector<8x64xf32>
    %c0_6 = arith.constant 0 : index
    %c0_7 = arith.constant 0 : index
    %8 = vector.load %arg3[%c0_6, %c0_7] : memref<1x64xf32, #tpu.memory_space<vmem>>, vector<1x64xf32>
    %c0_8 = arith.constant 0 : index
    %c0_9 = arith.constant 0 : index
    %9 = vector.load %arg4[%c0_8, %c0_9] : memref<32x1xf32, #tpu.memory_space<vmem>>, vector<32x1xf32>
    %c0_10 = arith.constant 0 : index
    %c0_11 = arith.constant 0 : index
    %10 = vector.load %arg5[%c0_10, %c0_11] : memref<1x32xf32, #tpu.memory_space<vmem>>, vector<1x32xf32>
    %cst_12 = arith.constant dense<0.000000e+00> : vector<16x64xf32>
    %11 = tpu.matmul %0, %7, %cst_12 {dimension_numbers = #tpu.dot_dimension_numbers<[1], [0], [0], [1], [0, 0, 1, 1], [], []>} : vector<16x8xf32>, vector<8x64xf32>, vector<16x64xf32> -> vector<16x64xf32>
    %12 = vector.broadcast %8 : vector<1x64xf32> to vector<16x64xf32>
    %13 = arith.addf %11, %12 : vector<16x64xf32>
    %14 = vector.extract_strided_slice %13 {offsets = [0, 0], sizes = [16, 32], strides = [1, 1]} : vector<16x64xf32> to vector<16x32xf32>
    %15 = vector.extract_strided_slice %13 {offsets = [0, 32], sizes = [16, 32], strides = [1, 1]} : vector<16x64xf32> to vector<16x32xf32>
    %16 = tpu.transpose %14, [1, 0] : vector<16x32xf32> -> vector<32x16xf32>
    %17 = arith.truncf %16 : vector<32x16xf32> to vector<32x16xbf16>
    %18 = arith.truncf %15 : vector<16x32xf32> to vector<16x32xbf16>
    %19 = vector.shape_cast %18 : vector<16x32xbf16> to vector<16x32x1xbf16>
    %20 = vector.shape_cast %17 : vector<32x16xbf16> to vector<1x32x16xbf16>
    %21 = vector.broadcast %19 : vector<16x32x1xbf16> to vector<16x32x16xbf16>
    %22 = vector.broadcast %20 : vector<1x32x16xbf16> to vector<16x32x16xbf16>
    %23 = arith.addf %21, %22 : vector<16x32x16xbf16>
    %cst_13 = arith.constant 2.001950e-01 : bf16
    %24 = vector.broadcast %cst_13 : bf16 to vector<16x32x16xbf16>
    %25 = arith.mulf %24, %23 : vector<16x32x16xbf16>
    %26 = arith.maximumf %23, %25 : vector<16x32x16xbf16>
    %27 = arith.truncf %9 : vector<32x1xf32> to vector<32x1xbf16>
    %28 = vector.shape_cast %27 : vector<32x1xbf16> to vector<1x32x1xbf16>
    %29 = vector.broadcast %28 : vector<1x32x1xbf16> to vector<16x32x16xbf16>
    %30 = arith.mulf %26, %29 : vector<16x32x16xbf16>
    %31 = arith.extf %30 : vector<16x32x16xbf16> to vector<16x32x16xf32>
    %cst_14 = arith.constant dense<0.000000e+00> : vector<16x16xf32>
    %32 = vector.multi_reduction <add>, %31, %cst_14 [1] : vector<16x32x16xf32> to vector<16x16xf32>
    %33 = arith.addf %32, %6 : vector<16x16xf32>
    %cst_15 = arith.constant dense<0xFF800000> : vector<16xf32>
    %34 = vector.multi_reduction <maximumf>, %33, %cst_15 [1] : vector<16x16xf32> to vector<16xf32>
    %35 = vector.shape_cast %34 : vector<16xf32> to vector<16x1xf32>
    %36 = vector.broadcast %35 : vector<16x1xf32> to vector<16x16xf32>
    %37 = arith.subf %33, %36 : vector<16x16xf32>
    %38 = arith.truncf %37 : vector<16x16xf32> to vector<16x16xbf16>
    %39 = math.exp %38 : vector<16x16xbf16>
    %40 = arith.extf %39 : vector<16x16xbf16> to vector<16x16xf32>
    %cst_16 = arith.constant dense<0.000000e+00> : vector<16xf32>
    %41 = vector.multi_reduction <add>, %40, %cst_16 [1] : vector<16x16xf32> to vector<16xf32>
    %42 = vector.shape_cast %41 : vector<16xf32> to vector<16x1xf32>
    %43 = arith.extf %39 : vector<16x16xbf16> to vector<16x16xf32>
    %44 = tpu.reciprocal %42 {approx = true} : vector<16x1xf32> -> vector<16x1xf32>
    %45 = vector.broadcast %44 : vector<16x1xf32> to vector<16x16xf32>
    %46 = arith.mulf %43, %45 : vector<16x16xf32>
    %47 = arith.truncf %46 : vector<16x16xf32> to vector<16x16xbf16>
    %48 = arith.truncf %14 : vector<16x32xf32> to vector<16x32xbf16>
    %cst_17 = arith.constant dense<0.000000e+00> : vector<16x32xf32>
    %49 = tpu.matmul %47, %48, %cst_17 {dimension_numbers = #tpu.dot_dimension_numbers<[1], [0], [0], [1], [0, 0, 1, 1], [], []>} : vector<16x16xbf16>, vector<16x32xbf16>, vector<16x32xf32> -> vector<16x32xf32>
    %50 = vector.broadcast %10 : vector<1x32xf32> to vector<16x32xf32>
    %51 = arith.addf %49, %50 : vector<16x32xf32>
    %cst_18 = arith.constant 0.000000e+00 : f32
    %52 = vector.broadcast %cst_18 : f32 to vector<16x32xf32>
    %53 = arith.maximumf %51, %52 : vector<16x32xf32>
    %c0_19 = arith.constant 0 : index
    %c0_20 = arith.constant 0 : index
    %54 = vector.load %arg6[%c0_19, %c0_20] : memref<32x64xf32, #tpu.memory_space<vmem>>, vector<32x64xf32>
    %c0_21 = arith.constant 0 : index
    %c0_22 = arith.constant 0 : index
    %55 = vector.load %arg7[%c0_21, %c0_22] : memref<1x64xf32, #tpu.memory_space<vmem>>, vector<1x64xf32>
    %c0_23 = arith.constant 0 : index
    %c0_24 = arith.constant 0 : index
    %56 = vector.load %arg8[%c0_23, %c0_24] : memref<32x1xf32, #tpu.memory_space<vmem>>, vector<32x1xf32>
    %c0_25 = arith.constant 0 : index
    %c0_26 = arith.constant 0 : index
    %57 = vector.load %arg9[%c0_25, %c0_26] : memref<1x32xf32, #tpu.memory_space<vmem>>, vector<1x32xf32>
    %cst_27 = arith.constant dense<0.000000e+00> : vector<16x64xf32>
    %58 = tpu.matmul %53, %54, %cst_27 {dimension_numbers = #tpu.dot_dimension_numbers<[1], [0], [0], [1], [0, 0, 1, 1], [], []>} : vector<16x32xf32>, vector<32x64xf32>, vector<16x64xf32> -> vector<16x64xf32>
    %59 = vector.broadcast %55 : vector<1x64xf32> to vector<16x64xf32>
    %60 = arith.addf %58, %59 : vector<16x64xf32>
    %61 = vector.extract_strided_slice %60 {offsets = [0, 0], sizes = [16, 32], strides = [1, 1]} : vector<16x64xf32> to vector<16x32xf32>
    %62 = vector.extract_strided_slice %60 {offsets = [0, 32], sizes = [16, 32], strides = [1, 1]} : vector<16x64xf32> to vector<16x32xf32>
    %63 = tpu.transpose %61, [1, 0] : vector<16x32xf32> -> vector<32x16xf32>
    %64 = arith.truncf %63 : vector<32x16xf32> to vector<32x16xbf16>
    %65 = arith.truncf %62 : vector<16x32xf32> to vector<16x32xbf16>
    %66 = vector.shape_cast %65 : vector<16x32xbf16> to vector<16x32x1xbf16>
    %67 = vector.shape_cast %64 : vector<32x16xbf16> to vector<1x32x16xbf16>
    %68 = vector.broadcast %66 : vector<16x32x1xbf16> to vector<16x32x16xbf16>
    %69 = vector.broadcast %67 : vector<1x32x16xbf16> to vector<16x32x16xbf16>
    %70 = arith.addf %68, %69 : vector<16x32x16xbf16>
    %cst_28 = arith.constant 2.001950e-01 : bf16
    %71 = vector.broadcast %cst_28 : bf16 to vector<16x32x16xbf16>
    %72 = arith.mulf %71, %70 : vector<16x32x16xbf16>
    %73 = arith.maximumf %70, %72 : vector<16x32x16xbf16>
    %74 = arith.truncf %56 : vector<32x1xf32> to vector<32x1xbf16>
    %75 = vector.shape_cast %74 : vector<32x1xbf16> to vector<1x32x1xbf16>
    %76 = vector.broadcast %75 : vector<1x32x1xbf16> to vector<16x32x16xbf16>
    %77 = arith.mulf %73, %76 : vector<16x32x16xbf16>
    %78 = arith.extf %77 : vector<16x32x16xbf16> to vector<16x32x16xf32>
    %cst_29 = arith.constant dense<0.000000e+00> : vector<16x16xf32>
    %79 = vector.multi_reduction <add>, %78, %cst_29 [1] : vector<16x32x16xf32> to vector<16x16xf32>
    %80 = arith.addf %79, %6 : vector<16x16xf32>
    %cst_30 = arith.constant dense<0xFF800000> : vector<16xf32>
    %81 = vector.multi_reduction <maximumf>, %80, %cst_30 [1] : vector<16x16xf32> to vector<16xf32>
    %82 = vector.shape_cast %81 : vector<16xf32> to vector<16x1xf32>
    %83 = vector.broadcast %82 : vector<16x1xf32> to vector<16x16xf32>
    %84 = arith.subf %80, %83 : vector<16x16xf32>
    %85 = arith.truncf %84 : vector<16x16xf32> to vector<16x16xbf16>
    %86 = math.exp %85 : vector<16x16xbf16>
    %87 = arith.extf %86 : vector<16x16xbf16> to vector<16x16xf32>
    %cst_31 = arith.constant dense<0.000000e+00> : vector<16xf32>
    %88 = vector.multi_reduction <add>, %87, %cst_31 [1] : vector<16x16xf32> to vector<16xf32>
    %89 = vector.shape_cast %88 : vector<16xf32> to vector<16x1xf32>
    %90 = arith.extf %86 : vector<16x16xbf16> to vector<16x16xf32>
    %91 = tpu.reciprocal %89 {approx = true} : vector<16x1xf32> -> vector<16x1xf32>
    %92 = vector.broadcast %91 : vector<16x1xf32> to vector<16x16xf32>
    %93 = arith.mulf %90, %92 : vector<16x16xf32>
    %94 = arith.truncf %93 : vector<16x16xf32> to vector<16x16xbf16>
    %95 = arith.truncf %61 : vector<16x32xf32> to vector<16x32xbf16>
    %cst_32 = arith.constant dense<0.000000e+00> : vector<16x32xf32>
    %96 = tpu.matmul %94, %95, %cst_32 {dimension_numbers = #tpu.dot_dimension_numbers<[1], [0], [0], [1], [0, 0, 1, 1], [], []>} : vector<16x16xbf16>, vector<16x32xbf16>, vector<16x32xf32> -> vector<16x32xf32>
    %97 = vector.broadcast %57 : vector<1x32xf32> to vector<16x32xf32>
    %98 = arith.addf %96, %97 : vector<16x32xf32>
    %cst_33 = arith.constant 0.000000e+00 : f32
    %99 = vector.broadcast %cst_33 : f32 to vector<16x32xf32>
    %100 = arith.maximumf %98, %99 : vector<16x32xf32>
    %c0_34 = arith.constant 0 : index
    %c0_35 = arith.constant 0 : index
    %101 = vector.load %arg10[%c0_34, %c0_35] : memref<32x4xf32, #tpu.memory_space<vmem>>, vector<32x4xf32>
    %cst_36 = arith.constant dense<0.000000e+00> : vector<16x4xf32>
    %102 = tpu.matmul %100, %101, %cst_36 {dimension_numbers = #tpu.dot_dimension_numbers<[1], [0], [0], [1], [0, 0, 1, 1], [], []>} : vector<16x32xf32>, vector<32x4xf32>, vector<16x4xf32> -> vector<16x4xf32>
    %c0_37 = arith.constant 0 : index
    %c0_38 = arith.constant 0 : index
    %103 = vector.load %arg11[%c0_37, %c0_38] : memref<1x4xf32, #tpu.memory_space<vmem>>, vector<1x4xf32>
    %104 = vector.broadcast %103 : vector<1x4xf32> to vector<16x4xf32>
    %105 = arith.addf %102, %104 : vector<16x4xf32>
    %cst_39 = arith.constant dense<0xFF800000> : vector<16xf32>
    %106 = vector.multi_reduction <maximumf>, %105, %cst_39 [1] : vector<16x4xf32> to vector<16xf32>
    %107 = vector.shape_cast %106 : vector<16xf32> to vector<16x1xf32>
    %108 = vector.broadcast %107 : vector<16x1xf32> to vector<16x4xf32>
    %109 = arith.subf %105, %108 : vector<16x4xf32>
    %110 = math.exp %109 : vector<16x4xf32>
    %cst_40 = arith.constant dense<0.000000e+00> : vector<16xf32>
    %111 = vector.multi_reduction <add>, %110, %cst_40 [1] : vector<16x4xf32> to vector<16xf32>
    %112 = vector.shape_cast %111 : vector<16xf32> to vector<16x1xf32>
    %113 = vector.broadcast %112 : vector<16x1xf32> to vector<16x4xf32>
    %114 = arith.divf %110, %113 : vector<16x4xf32>
    %c0_41 = arith.constant 0 : index
    %c0_42 = arith.constant 0 : index
    %115 = vector.load %arg12[%c0_41, %c0_42] : memref<16x4xf32, #tpu.memory_space<vmem>>, vector<16x4xf32>
    tpu.vector_store %arg12[%c0_41, %c0_42], %114 {strides = array<i32>} : memref<16x4xf32, #tpu.memory_space<vmem>>, vector<16x4xf32>,
    return
  }
}

</mosaic_0001>

<bundles_post_ra>
// kernel: gatv2_forward.1
= control target key start
LH: loop header
LB: loop body
LE: loop exit
PB: predicated region body
PF: predicated region fallthrough
CT: control target
= control target key end

     0   :  { %vm68_vm0 = vcmask 64512   ;;  %v2731_v3 = vmov 0   ;;  %v4101_v10 = vmov 0.0   ;;  %v188_v11 = vlaneseq  ;;  %s4088_s2 = inlined_call_operand.vmem [shape: f32[8,64], index: 2, kind: input, shape index: {}]   ;;  %s4089_s0 = inlined_call_operand.vmem [shape: f32[16,8], index: 0, kind: input, shape index: {}]   ;;  %s4090_s4 = inlined_call_operand.vmem [shape: f32[32,1], index: 4, kind: input, shape index: {}]   ;;  %s4091_s3 = inlined_call_operand.vmem [shape: f32[1,64], index: 3, kind: input, shape index: {}]   ;;  %s4092_s1 = inlined_call_operand.vmem [shape: s8[16,16], index: 1, kind: input, shape index: {}]   ;;  %s4093_s8 = inlined_call_operand.vmem [shape: f32[32,1], index: 8, kind: input, shape index: {}]   ;;  %s4094_s6 = inlined_call_operand.vmem [shape: f32[32,64], index: 6, kind: input, shape index: {}]   ;;  %s4095_s5 = inlined_call_operand.vmem [shape: f32[1,32], index: 5, kind: input, shape index: {}]   ;;  %s4096_s7 = inlined_call_operand.vmem [shape: f32[1,64], index: 7, kind: input, shape index: {}]   ;;  %s4097_s10 = inlined_call_operand.vmem [shape: f32[32,4], index: 10, kind: input, shape index: {}]   ;;  %s4098_s9 = inlined_call_operand.vmem [shape: f32[1,32], index: 9, kind: input, shape index: {}]   ;;  %s4099_s11 = inlined_call_operand.vmem [shape: f32[1,4], index: 11, kind: input, shape index: {}]   ;;  %s4100_s12 = inlined_call_operand.vmem [shape: f32[16,4], index: 12, kind: output, shape index: {}]  }
   0x1   :  { %v55_v0 = vld [vmem:[%s4088_s2] sm:$0xff]  ;;  %v44_v2 = vld [vmem:[%s4089_s0 + $0x8] sm:$0xff]  ;;  %2650 = vset.pattern.permute.xlu1 %v2731_v3  ;;  %2649 = vset.pattern.permute.xlu0 %v2731_v3  ;;  %v59_v4 = vld [vmem:[%s4090_s4 + $0x10] sm:$0xff]  ;;  %vm587_vm1 = vcmask 130048   ;;  %vm861_vm2 = vcmask 1041409   ;;  %vm864_vm3 = vcmask 1042434  }
   0x2   :  { %v43_v1 = vld [vmem:[%s4089_s0] sm:$0xff]  ;;  %2591 = vmatprep.subr.mxu0 %v55_v0  ;;  %v60_v5 = vld [vmem:[%s4090_s4 + $0x18] sm:$0xff]  ;;  %v58_v8 = vld [vmem:[%s4090_s4 + $0x8] sm:$0xff]  ;;  %2596 = vmatprep.subr.bf16.mxu1 %v4101_v10  ;;  %v189_v14 = vshrl.u32 %v188_v11, 7  ;;  %vm867_vm4 = vcmask 1043459   ;;  %vm870_vm5 = vcmask 1044484  }
   0x3   :  { %2593 = vmatprep.mubr.msk.f32.mxu0 %vm68_vm0, %v43_v1  ;;  %v57_v6 = vld [vmem:[%s4090_s4] sm:$0xff]  ;;  %2592 = vmatpush3.msra.mxu0 %v55_v0  ;;  %v480_v7 = vpack.c.bf16 %v60_v5, %v59_v4  ;;  %vm873_vm6 = vcmask 1045509   ;;  %vm876_vm7 = vcmask 1046534   ;;  %vm879_vm8 = vcmask 1047559  }
   0x4   :  { %2594 = vmatmul.mubr.msk.f32.vlgmr.msra.gmra.mrb[0].mxu0 %vm68_vm0, %v44_v2  ;;  %v479_v9 = vpack.c.bf16 %v58_v8, %v57_v6  ;;  %v2555_v12 = vld [vmem:[%s4091_s3] ss:$0 sm:$0xff]  ;;  %v2829_v19 = vsub.s32 5, %v189_v14  ;;  %v2831_v20 = vsub.s32 1, %v189_v14  ;;  %v2836_v24 = vsub.s32 4, %v189_v14 }
   0x5   :  { %488 = vperm.xlu1 %2650, %v480_v7   ;;  %v2838_v25 = vsub.s32 0, %v189_v14  ;;  %v2842_v28 = vsub.s32 2, %v189_v14  ;;  %v2845_v30 = vsub.s32 6, %v189_v14  ;;  %v2848_v32 = vsub.s32 3, %v189_v14 }
   0x6   :  { %483 = vperm.xlu0 %2649, %v479_v9   ;;  %4122 = vst [vmem:[#allocation2_spill] sm:$0xff] %v2829_v19  ;;  %4123 = vst [vmem:[#allocation3_spill] sm:$0xff] %v2831_v20  ;;  %v2851_v34 = vsub.s32 7, %v189_v14  ;;  %v2569_v9 = vld [vmem:[%s4092_s1] sm:$0xf]   ;;  %vm2733_vm9 = vmmov 0  }
   0x7   :  { %4124 = vst [vmem:[#allocation4_spill] sm:$0xff] %v2836_v24  ;;  %4125 = vst [vmem:[#allocation5_spill] sm:$0xff] %v2838_v25  ;;  %v2571_v11 = vunpack.c.1.s8 %v2569_v9  ;;  %v2570_v14 = vunpack.c.0.s8 %v2569_v9  ;;  %vm1278_vm10 = vcmask 261120   ;;  %vm2524_vm11 = vcmask 31744  }
   0x8   :  { %4126 = vst [vmem:[#allocation6_spill] sm:$0xff] %v2842_v28  ;;  %4127 = vst [vmem:[#allocation7_spill] sm:$0xff] %v2845_v30 }
   0x9   :  { %4128 = vst [vmem:[#allocation8_spill] sm:$0xff] %v2848_v32  ;;  %4129 = vst [vmem:[#allocation9_spill] sm:$0xff] %v2851_v34 }
  0x84   :  { %v2867_v49 = vpop.permute.xlu1 %488 }
  0x85   :  { %v2863_v46 = vpop.permute.xlu0 %483 }
  0xd7   :  { %v2595_v13 = vpop.f32.mrb[0].mxu0 }
  0xd8   :  { %v2826_v15 = vadd.f32 %v2595_v13, %v2555_v12  ;;  %v141_v16 = vpop.f32.mrb[1].mxu0 }
  0xd9   :  { %v142_v17 = vadd.f32 %v2555_v12, %v141_v16  ;;  %v49_v16 = vcvt.s32.f32 %v2570_v14 }
  0xdb   :  { %v184_v18 = vpack.c.bf16 %v2826_v15, %v142_v17 }
  0xdd   :  { %v186_v21 = vpack.i.b16 %v184_v18, %v184_v18  ;;  %2597 = vmatpush3.bf16.msra.mxu1 %v184_v18  ;;  %v200_v35 = vshrl.u32 %v184_v18, 16 }
  0xde   :  { %2613 = vmatprep.subr.bf16.mxu1 %v4101_v10 }
  0xdf   :  { %v314_v22 = vrot.slane %v186_v21, %v2829_v19  ;;  %v218_v23 = vrot.slane %v186_v21, %v2831_v20  ;;  %v290_v26 = vrot.slane %v186_v21, %v2836_v24  ;;  %v191_v27 = vrot.slane %v186_v21, %v2838_v25 }
  0xe0   :  { %v242_v29 = vrot.slane %v186_v21, %v2842_v28  ;;  %v338_v31 = vrot.slane %v186_v21, %v2845_v30  ;;  %v266_v33 = vrot.slane %v186_v21, %v2848_v32  ;;  %v362_v36 = vrot.slane %v186_v21, %v2851_v34 }
  0xe1   :  { %317 = vbcast.lane.c.b16.xlu0 %v314_v22, 288  ;;  %221 = vbcast.lane.c.b16.xlu1 %v218_v23, 288  ;;  %v201_v37 = vpack.i.b16 %v200_v35, %v200_v35 }
  0xe3   :  { %v302_v38 = vrot.slane %v201_v37, %v2836_v24  ;;  %v206_v39 = vrot.slane %v201_v37, %v2838_v25  ;;  %v230_v40 = vrot.slane %v201_v37, %v2831_v20  ;;  %v326_v41 = vrot.slane %v201_v37, %v2829_v19 }
  0xe4   :  { %v254_v42 = vrot.slane %v201_v37, %v2842_v28  ;;  %v350_v43 = vrot.slane %v201_v37, %v2845_v30  ;;  %v278_v44 = vrot.slane %v201_v37, %v2848_v32  ;;  %v374_v45 = vrot.slane %v201_v37, %v2851_v34 }
  0xe5   :  { %293 = vbcast.lane.c.b16.xlu1 %v290_v26, 288  ;;  %194 = vbcast.lane.c.b16.xlu0 %v191_v27, 288 }
  0xe9   :  { %245 = vbcast.lane.c.b16.xlu1 %v242_v29, 288  ;;  %225 = vbcast.lane.c.b16.xlu0 %v218_v23, 304 }
  0xed   :  { %341 = vbcast.lane.c.b16.xlu1 %v338_v31, 288  ;;  %321 = vbcast.lane.c.b16.xlu0 %v314_v22, 304  ;;  %v2553_v22 = vadd.f32 -1.0, %v49_v16 }
  0xf1   :  { %297 = vbcast.lane.c.b16.xlu1 %v290_v26, 304  ;;  %198 = vbcast.lane.c.b16.xlu0 %v191_v27, 304 }
  0xf5   :  { %269 = vbcast.lane.c.b16.xlu1 %v266_v33, 288  ;;  %249 = vbcast.lane.c.b16.xlu0 %v242_v29, 304  ;;  %v2918_v29 = vmul.f32 1e+30, %v2553_v22 }
  0xf9   :  { %365 = vbcast.lane.c.b16.xlu1 %v362_v36, 288  ;;  %345 = vbcast.lane.c.b16.xlu0 %v338_v31, 304 }
  0xfd   :  { %369 = vbcast.lane.c.b16.xlu1 %v362_v36, 304  ;;  %273 = vbcast.lane.c.b16.xlu0 %v266_v33, 304 }
 0x101   :  { %305 = vbcast.lane.c.b16.xlu1 %v302_v38, 288  ;;  %209 = vbcast.lane.c.b16.xlu0 %v206_v39, 288 }
 0x105   :  { %213 = vbcast.lane.c.b16.xlu1 %v206_v39, 304  ;;  %233 = vbcast.lane.c.b16.xlu0 %v230_v40, 288 }
 0x109   :  { %329 = vbcast.lane.c.b16.xlu1 %v326_v41, 288  ;;  %309 = vbcast.lane.c.b16.xlu0 %v302_v38, 304 }
 0x10d   :  { %237 = vbcast.lane.c.b16.xlu1 %v230_v40, 304  ;;  %257 = vbcast.lane.c.b16.xlu0 %v254_v42, 288 }
 0x111   :  { %353 = vbcast.lane.c.b16.xlu1 %v350_v43, 288  ;;  %333 = vbcast.lane.c.b16.xlu0 %v326_v41, 304 }
 0x115   :  { %281 = vbcast.lane.c.b16.xlu1 %v278_v44, 288  ;;  %261 = vbcast.lane.c.b16.xlu0 %v254_v42, 304 }
 0x119   :  { %377 = vbcast.lane.c.b16.xlu1 %v374_v45, 288  ;;  %357 = vbcast.lane.c.b16.xlu0 %v350_v43, 304 }
 0x11d   :  { %381 = vbcast.lane.c.b16.xlu1 %v374_v45, 304  ;;  %285 = vbcast.lane.c.b16.xlu0 %v278_v44, 304 }
 0x13b   :  { %150 = vxpose.xlu0.b32.start [1/2] (short) (narrow) %v142_v17, 32 }
 0x13f   :  { %151 = vxpose.xlu0.b32.end [2/2] (short) (narrow) %v2826_v15, 32  ;;  %v50_v15 = vcvt.s32.f32 %v2571_v11 }
 0x141   :  { %v2554_v21 = vadd.f32 -1.0, %v50_v15 }
 0x143   :  { %v2914_v26 = vmul.f32 1e+30, %v2554_v21 }
 0x153   :  { %v318_v47 = vpop.permute.xlu0 %317  ;;  %v2871_v51 = vpop.permute.xlu1 %221 }
 0x157   :  { %v2865_v48 = vpop.permute.xlu0 %194  ;;  %v294_v53 = vpop.permute.xlu1 %293 }
 0x15b   :  { %v2869_v50 = vpop.permute.xlu0 %225  ;;  %v2877_v55 = vpop.permute.xlu1 %245 }
 0x15f   :  { %v2873_v52 = vpop.permute.xlu0 %321  ;;  %v342_v57 = vpop.permute.xlu1 %341 }
 0x163   :  { %v2875_v54 = vpop.permute.xlu0 %198  ;;  %v2883_v59 = vpop.permute.xlu1 %297 }
 0x167   :  { %v2879_v56 = vpop.permute.xlu0 %249  ;;  %v2887_v61 = vpop.permute.xlu1 %269 }
 0x16b   :  { %v2881_v58 = vpop.permute.xlu0 %345  ;;  %v366_v63 = vpop.permute.xlu1 %365 }
 0x16f   :  { %v2885_v60 = vpop.permute.xlu0 %273  ;;  %v2893_v1 = vpop.permute.xlu1 %369 }
 0x173   :  { %v2889_v62 = vpop.permute.xlu0 %209  ;;  %v306_v3 = vpop.permute.xlu1 %305 }
 0x177   :  { %v2891_v0 = vpop.permute.xlu0 %233  ;;  %v2899_v5 = vpop.permute.xlu1 %213 }
 0x17b   :  { %v2895_v2 = vpop.permute.xlu0 %309  ;;  %v330_v7 = vpop.permute.xlu1 %329 }
 0x17f   :  { %v2897_v4 = vpop.permute.xlu0 %257  ;;  %v2908_v12 = vpop.permute.xlu1 %237 }
 0x183   :  { %v2901_v6 = vpop.permute.xlu0 %333  ;;  %v354_v17 = vpop.permute.xlu1 %353 }
 0x187   :  { %v2903_v8 = vpop.permute.xlu0 %261  ;;  %v2916_v27 = vpop.permute.xlu1 %281 }
 0x18b   :  { %v2910_v13 = vpop.permute.xlu0 %357  ;;  %v378_v9 = vpop.permute.xlu1 %377 }
 0x18f   :  { %v2912_v18 = vpop.permute.xlu0 %285 }
 0x1bb   :  { %v166_v23 = vpop.trf.xlu0 }
 0x1bf   :  { %v167_v31 = vpop.trf.xlu0 }
 0x1c0   :  { %v2924_v38 = vpack.c.bf16 %v167_v31, %v166_v23 }
 0x1c2   :  { %v399_v11 = vadd.bf16 %v294_v53, %v2924_v38  ;;  %v401_v14 = vadd.bf16 %v306_v3, %v2924_v38  ;;  %v403_v15 = vadd.bf16 %v318_v47, %v2924_v38  ;;  %v405_v16 = vadd.bf16 %v330_v7, %v2924_v38 }
 0x1c3   :  { %v168_v21 = vpop.trf.xlu0  ;;  %v407_v22 = vadd.bf16 %v342_v57, %v2924_v38  ;;  %v409_v23 = vadd.bf16 %v354_v17, %v2924_v38  ;;  %v411_v31 = vadd.bf16 %v366_v63, %v2924_v38  ;;  %v413_v10 = vadd.bf16 %v378_v9, %v2924_v38 }
 0x1c4   :  { %v431_v44 = vmul.bf16 1045249613, %v399_v11  ;;  %v433_v45 = vmul.bf16 1045249613, %v401_v14  ;;  %v435_v43 = vmul.bf16 1045249613, %v403_v15 }
 0x1c5   :  { %v437_v42 = vmul.bf16 1045249613, %v405_v16  ;;  %v439_v53 = vmul.bf16 1045249613, %v407_v22  ;;  %v441_v41 = vmul.bf16 1045249613, %v409_v23 }
 0x1c6   :  { %v443_v3 = vmul.bf16 1045249613, %v411_v31  ;;  %v445_v40 = vmul.bf16 1045249613, %v413_v10  ;;  %v463_v47 = vmax.bf16 %v431_v44, %v399_v11  ;;  %v465_v39 = vmax.bf16 %v433_v45, %v401_v14 }
 0x1c7   :  { %v169_v7 = vpop.trf.xlu0  ;;  %v467_v37 = vmax.bf16 %v435_v43, %v403_v15  ;;  %v469_v36 = vmax.bf16 %v437_v42, %v405_v16  ;;  %v471_v57 = vmax.bf16 %v439_v53, %v407_v22  ;;  %v473_v35 = vmax.bf16 %v441_v41, %v409_v23  ;;  %v382_v41 = vpop.permute.xlu1 %381 }
 0x1c8   :  { %v2941_v17 = vpack.c.bf16 %v169_v7, %v168_v21  ;;  %v475_v63 = vmax.bf16 %v443_v3, %v411_v31  ;;  %v477_v33 = vmax.bf16 %v445_v40, %v413_v10  ;;  %v2944_v9 = vmul.bf16 %v2863_v46, %v463_v47 }
 0x1c9   :  { %v2947_v34 = vmul.bf16 %v2863_v46, %v465_v39  ;;  %v2950_v32 = vmul.bf16 %v2863_v46, %v467_v37  ;;  %v2953_v44 = vmul.bf16 %v2863_v46, %v469_v36  ;;  %v2956_v42 = vmul.bf16 %v2863_v46, %v471_v57 }
 0x1ca   :  { %v400_v43 = vadd.bf16 %v2883_v59, %v2941_v17  ;;  %v402_v10 = vadd.bf16 %v2895_v2, %v2941_v17  ;;  %v404_v39 = vadd.bf16 %v2873_v52, %v2941_v17  ;;  %v406_v37 = vadd.bf16 %v2901_v6, %v2941_v17 }
 0x1cb   :  { %v408_v36 = vadd.bf16 %v2881_v58, %v2941_v17  ;;  %v410_v40 = vadd.bf16 %v2910_v13, %v2941_v17  ;;  %v412_v45 = vadd.bf16 %v2893_v1, %v2941_v17  ;;  %v414_v59 = vadd.bf16 %v382_v41, %v2941_v17 }
 0x1cc   :  { %v432_v11 = vmul.bf16 1045249613, %v400_v43  ;;  %v434_v14 = vmul.bf16 1045249613, %v402_v10  ;;  %v436_v2 = vmul.bf16 1045249613, %v404_v39  ;;  %v2974_v15 = vmul.bf16 %v2863_v46, %v473_v35 }
 0x1cd   :  { %v438_v52 = vmul.bf16 1045249613, %v406_v37  ;;  %v440_v16 = vmul.bf16 1045249613, %v408_v36  ;;  %v442_v6 = vmul.bf16 1045249613, %v410_v40  ;;  %v2977_v21 = vmul.bf16 %v2863_v46, %v475_v63 }
 0x1ce   :  { %v444_v58 = vmul.bf16 1045249613, %v412_v45  ;;  %v446_v22 = vmul.bf16 1045249613, %v414_v59  ;;  %v464_v13 = vmax.bf16 %v432_v11, %v400_v43  ;;  %v466_v23 = vmax.bf16 %v434_v14, %v402_v10 }
 0x1cf   :  { %v468_v31 = vmax.bf16 %v436_v2, %v404_v39  ;;  %v470_v1 = vmax.bf16 %v438_v52, %v406_v37  ;;  %v472_v53 = vmax.bf16 %v440_v16, %v408_v36  ;;  %v474_v3 = vmax.bf16 %v442_v6, %v410_v40 }
 0x1d0   :  { %v476_v47 = vmax.bf16 %v444_v58, %v412_v45  ;;  %v478_v7 = vmax.bf16 %v446_v22, %v414_v59  ;;  %v508_v35 = vmul.bf16 %v2867_v49, %v464_v13  ;;  %v510_v57 = vmul.bf16 %v2867_v49, %v466_v23 }
 0x1d1   :  { %v512_v41 = vmul.bf16 %v2867_v49, %v468_v31  ;;  %v514_v63 = vmul.bf16 %v2867_v49, %v470_v1  ;;  %v2984_v24 = vmul.bf16 %v2867_v49, %v472_v53  ;;  %v2987_v43 = vmul.bf16 %v2867_v49, %v474_v3 }
 0x1d2   :  { %v2990_v10 = vmul.bf16 %v2867_v49, %v476_v47  ;;  %v2993_v39 = vmul.bf16 %v2863_v46, %v477_v33  ;;  %v2996_v37 = vmul.bf16 %v2867_v49, %v478_v7  ;;  %v555_v36 = vunpack.c.l.bf16 %v2944_v9 }
 0x1d3   :  { %v556_v40 = vunpack.c.h.bf16 %v2944_v9  ;;  %v557_v45 = vunpack.c.l.bf16 %v508_v35  ;;  %v558_v59 = vunpack.c.h.bf16 %v508_v35  ;;  %v559_v11 = vunpack.c.l.bf16 %v2947_v34 }
 0x1d4   :  { %v560_v14 = vunpack.c.h.bf16 %v2947_v34  ;;  %v561_v2 = vunpack.c.l.bf16 %v510_v57  ;;  %v562_v52 = vunpack.c.h.bf16 %v510_v57  ;;  %v563_v16 = vunpack.c.l.bf16 %v2950_v32 }
 0x1d5   :  { %v564_v33 = vunpack.c.h.bf16 %v2950_v32  ;;  %v565_v6 = vunpack.c.l.bf16 %v512_v41  ;;  %v566_v58 = vunpack.c.h.bf16 %v512_v41  ;;  %v567_v22 = vunpack.c.l.bf16 %v2953_v44 }
 0x1d6   :  { %v568_v13 = vunpack.c.h.bf16 %v2953_v44  ;;  %v569_v23 = vunpack.c.l.bf16 %v514_v63  ;;  %v570_v9 = vunpack.c.h.bf16 %v514_v63  ;;  %v571_v31 = vunpack.c.l.bf16 %v2956_v42 }
 0x1d7   :  { %v572_v1 = vunpack.c.h.bf16 %v2956_v42  ;;  %v573_v34 = vunpack.c.l.bf16 %v2984_v24  ;;  %v574_v53 = vunpack.c.h.bf16 %v2984_v24  ;;  %v575_v3 = vunpack.c.l.bf16 %v2974_v15 }
 0x1d8   :  { %v576_v32 = vunpack.c.h.bf16 %v2974_v15  ;;  %v577_v47 = vunpack.c.l.bf16 %v2987_v43  ;;  %v578_v7 = vunpack.c.h.bf16 %v2987_v43  ;;  %v579_v44 = vunpack.c.l.bf16 %v2977_v21 }
 0x1d9   :  { %v580_v35 = vunpack.c.h.bf16 %v2977_v21  ;;  %v581_v57 = vunpack.c.l.bf16 %v2990_v10  ;;  %v692_v30 = vsel %vm587_vm1, %v555_v36, 0.0  ;;  %v693_v43 = vsel %vm587_vm1, %v556_v40, 0.0 }
 0x1da   :  { %v695_v28 = vsel %vm587_vm1, %v557_v45, 0.0  ;;  %v697_v21 = vsel %vm587_vm1, %v558_v59, 0.0  ;;  %v705_v25 = vsel %vm587_vm1, %v559_v11, 0.0  ;;  %v694_v20 = vadd.f32 %v693_v43, %v692_v30 }
 0x1db   :  { %v706_v42 = vsel %vm587_vm1, %v560_v14, 0.0  ;;  %v708_v41 = vsel %vm587_vm1, %v561_v2, 0.0  ;;  %v710_v24 = vsel %vm587_vm1, %v562_v52, 0.0  ;;  %v718_v15 = vsel %vm587_vm1, %v563_v16, 0.0 }
 0x1dc   :  { %v707_v63 = vadd.f32 %v706_v42, %v705_v25  ;;  %v719_v36 = vsel %vm587_vm1, %v564_v33, 0.0  ;;  %v721_v40 = vsel %vm587_vm1, %v565_v6, 0.0  ;;  %v696_v19 = vadd.f32 %v695_v28, %v694_v20 }
 0x1dd   :  { %v720_v45 = vadd.f32 %v719_v36, %v718_v15  ;;  %v723_v59 = vsel %vm587_vm1, %v566_v58, 0.0  ;;  %v731_v11 = vsel %vm587_vm1, %v567_v22, 0.0  ;;  %v732_v14 = vsel %vm587_vm1, %v568_v13, 0.0 }
 0x1de   :  { %v709_v30 = vadd.f32 %v708_v41, %v707_v63  ;;  %v734_v2 = vsel %vm587_vm1, %v569_v23, 0.0  ;;  %v736_v52 = vsel %vm587_vm1, %v570_v9, 0.0  ;;  %v698_v25 = vadd.f32 %v697_v21, %v696_v19 }
 0x1df   :  { %v722_v42 = vadd.f32 %v721_v40, %v720_v45  ;;  %v733_v16 = vadd.f32 %v732_v14, %v731_v11  ;;  %v744_v33 = vsel %vm587_vm1, %v571_v31, 0.0  ;;  %v745_v20 = vsel %vm587_vm1, %v572_v1, 0.0 }
 0x1e0   :  { %v711_v43 = vadd.f32 %v710_v24, %v709_v30  ;;  %v747_v28 = vsel %vm587_vm1, %v573_v34, 0.0  ;;  %v749_v6 = vsel %vm587_vm1, %v574_v53, 0.0  ;;  %v699_v58 = vrot.slane %v698_v25, 4 }
 0x1e1   :  { %v724_v22 = vadd.f32 %v723_v59, %v722_v42  ;;  %v735_v41 = vadd.f32 %v734_v2, %v733_v16  ;;  %v746_v13 = vadd.f32 %v745_v20, %v744_v33  ;;  %v757_v23 = vsel %vm587_vm1, %v575_v3, 0.0 }
 0x1e2   :  { %v712_v63 = vrot.slane %v711_v43, 4  ;;  %v758_v19 = vsel %vm587_vm1, %v576_v32, 0.0  ;;  %v760_v9 = vsel %vm587_vm1, %v577_v47, 0.0  ;;  %v700_v15 = vadd.f32 %v699_v58, %v698_v25 }
 0x1e3   :  { %v725_v31 = vrot.slane %v724_v22, 4  ;;  %v737_v24 = vadd.f32 %v736_v52, %v735_v41  ;;  %v748_v21 = vadd.f32 %v747_v28, %v746_v13  ;;  %v759_v36 = vadd.f32 %v758_v19, %v757_v23 }
 0x1e4   :  { %v713_v1 = vadd.f32 %v712_v63, %v711_v43  ;;  %v762_v34 = vsel %vm587_vm1, %v578_v7, 0.0  ;;  %v770_v53 = vsel %vm587_vm1, %v579_v44, 0.0  ;;  %v701_v40 = vrot.slane %v700_v15, 2 }
 0x1e5   :  { %v726_v45 = vadd.f32 %v725_v31, %v724_v22  ;;  %v738_v59 = vrot.slane %v737_v24, 4  ;;  %v750_v11 = vadd.f32 %v749_v6, %v748_v21  ;;  %v761_v3 = vadd.f32 %v760_v9, %v759_v36 }
 0x1e6   :  { %v714_v30 = vrot.slane %v713_v1, 2  ;;  %v771_v32 = vsel %vm587_vm1, %v580_v35, 0.0  ;;  %v773_v47 = vsel %vm587_vm1, %v581_v57, 0.0  ;;  %v702_v14 = vadd.f32 %v701_v40, %v700_v15 }
 0x1e7   :  { %v727_v2 = vrot.slane %v726_v45, 2  ;;  %v739_v52 = vadd.f32 %v738_v59, %v737_v24  ;;  %v751_v25 = vrot.slane %v750_v11, 4  ;;  %v763_v16 = vadd.f32 %v762_v34, %v761_v3 }
 0x1e8   :  { %v715_v42 = vadd.f32 %v714_v30, %v713_v1  ;;  %v772_v33 = vadd.f32 %v771_v32, %v770_v53  ;;  %v4130_v7 = vunpack.c.h.bf16 %v2990_v10  ;;  %v703_v43 = vrot.slane %v702_v14, 1 }
 0x1e9   :  { %v728_v20 = vadd.f32 %v727_v2, %v726_v45  ;;  %v740_v28 = vrot.slane %v739_v52, 2  ;;  %v752_v6 = vadd.f32 %v751_v25, %v750_v11  ;;  %v764_v35 = vrot.slane %v763_v16, 4 }
 0x1ea   :  { %v775_v44 = vsel %vm587_vm1, %v4130_v7, 0.0  ;;  %v716_v58 = vrot.slane %v715_v42, 1  ;;  %v774_v22 = vadd.f32 %v773_v47, %v772_v33  ;;  %v4131_v57 = vunpack.c.l.bf16 %v2993_v39 }
 0x1eb   :  { %v704_v13 = vadd.f32 %v703_v43, %v702_v14  ;;  %v729_v63 = vrot.slane %v728_v20, 1  ;;  %v741_v23 = vadd.f32 %v740_v28, %v739_v52  ;;  %v753_v19 = vrot.slane %v752_v6, 2 }
 0x1ec   :  { %v783_v41 = vsel %vm587_vm1, %v4131_v57, 0.0  ;;  %v717_v10 = vadd.f32 %v716_v58, %v715_v42  ;;  %v765_v9 = vadd.f32 %v764_v35, %v763_v16  ;;  %v776_v15 = vadd.f32 %v775_v44, %v774_v22 }
 0x1ed   :  { %v4132_v31 = vunpack.c.h.bf16 %v2993_v39  ;;  %v730_v21 = vadd.f32 %v729_v63, %v728_v20  ;;  %v742_v1 = vrot.slane %v741_v23, 1  ;;  %v754_v36 = vadd.f32 %v753_v19, %v752_v6 }
 0x1ee   :  { %v766_v53 = vrot.slane %v765_v9, 2  ;;  %v777_v40 = vrot.slane %v776_v15, 4  ;;  %v4133_v45 = vunpack.c.l.bf16 %v2996_v37  ;;  %v3063_v11 = vadd.bf16 %v2865_v48, %v2924_v38 }
 0x1ef   :  { %v784_v24 = vsel %vm587_vm1, %v4132_v31, 0.0  ;;  %v743_v30 = vadd.f32 %v742_v1, %v741_v23  ;;  %v755_v3 = vrot.slane %v754_v36, 1  ;;  %v4134_v32 = vunpack.c.h.bf16 %v2996_v37 }
 0x1f0   :  { %v785_v34 = vadd.f32 %v784_v24, %v783_v41  ;;  %v786_v59 = vsel %vm587_vm1, %v4133_v45, 0.0  ;;  %v767_v14 = vadd.f32 %v766_v53, %v765_v9  ;;  %v778_v2 = vadd.f32 %v777_v40, %v776_v15 }
 0x1f1   :  { %v788_v47 = vsel %vm587_vm1, %v4134_v32, 0.0  ;;  %v4135_v52 = vrot.slane %v2914_v26, 1  ;;  %v4136_v42 = vrot.slane %v2914_v26, 2  ;;  %v756_v48 = vadd.f32 %v755_v3, %v754_v36 }
 0x1f2   :  { %v787_v39 = vadd.f32 %v786_v59, %v785_v34  ;;  %v3077_v7 = vadd.f32 %v704_v13, %v2914_v26  ;;  %v4137_v37 = vrot.slane %v2914_v26, 3  ;;  %v768_v43 = vrot.slane %v767_v14, 1 }
 0x1f3   :  { %v3070_v25 = vadd.f32 %v4135_v52, %v717_v10  ;;  %v3074_v16 = vadd.f32 %v4136_v42, %v730_v21  ;;  %v779_v20 = vrot.slane %v778_v2, 2  ;;  %v4138_v35 = vrot.slane %v2914_v26, 4 }
 0x1f4   :  { %v789_v33 = vadd.f32 %v788_v47, %v787_v39  ;;  %v3081_v44 = vadd.f32 %v4137_v37, %v743_v30  ;;  %v384_v57 = vadd.bf16 %v2875_v54, %v2941_v17  ;;  %v385_v41 = vadd.bf16 %v2889_v62, %v2924_v38 }
 0x1f5   :  { %v881_v28 = vrot.slane %v3070_v25, 7  ;;  %v883_v6 = vrot.slane %v3074_v16, 6  ;;  %v3087_v22 = vadd.f32 %v4138_v35, %v756_v48  ;;  %v769_v13 = vadd.f32 %v768_v43, %v767_v14 }
 0x1f6   :  { %v790_v58 = vrot.slane %v789_v33, 4  ;;  %v780_v63 = vadd.f32 %v779_v20, %v778_v2  ;;  %v885_v19 = vrot.slane %v3081_v44, 5  ;;  %v386_v31 = vadd.bf16 %v2899_v5, %v2941_v17 }
 0x1f7   :  { %v882_v23 = vsel %vm861_vm2, %v881_v28, %v3077_v7  ;;  %v887_v15 = vrot.slane %v3087_v22, 4  ;;  %v4139_v24 = vrot.slane %v2914_v26, 5  ;;  %v387_v1 = vadd.bf16 %v2871_v51, %v2924_v38 }
 0x1f8   :  { %v791_v10 = vadd.f32 %v790_v58, %v789_v33  ;;  %v884_v9 = vsel %vm864_vm3, %v883_v6, %v882_v23  ;;  %v781_v54 = vrot.slane %v780_v63, 1  ;;  %v388_v53 = vadd.bf16 %v2869_v50, %v2941_v17 }
 0x1f9   :  { %v3102_v62 = vadd.f32 %v4139_v24, %v769_v13  ;;  %v886_v21 = vsel %vm867_vm4, %v885_v19, %v884_v9  ;;  %v389_v40 = vadd.bf16 %v2891_v0, %v2924_v38  ;;  %v390_v59 = vadd.bf16 %v2908_v12, %v2941_v17 }
 0x1fa   :  { %v792_v36 = vrot.slane %v791_v10, 2  ;;  %v888_v34 = vsel %vm870_vm5, %v887_v15, %v886_v21  ;;  %v782_v5 = vadd.f32 %v781_v54, %v780_v63  ;;  %v391_v30 = vadd.bf16 %v2877_v55, %v2924_v38 }
 0x1fb   :  { %v889_v45 = vrot.slane %v3102_v62, 3  ;;  %v392_v3 = vadd.bf16 %v2879_v56, %v2941_v17  ;;  %v393_v50 = vadd.bf16 %v2897_v4, %v2924_v38  ;;  %v394_v0 = vadd.bf16 %v2903_v8, %v2941_v17 }
 0x1fc   :  { %v793_v51 = vadd.f32 %v792_v36, %v791_v10  ;;  %v4140_v39 = vrot.slane %v2914_v26, 6  ;;  %v395_v12 = vadd.bf16 %v2887_v61, %v2924_v38  ;;  %v396_v55 = vadd.bf16 %v2885_v60, %v2941_v17 }
 0x1fd   :  { %v890_v47 = vsel %vm873_vm6, %v889_v45, %v888_v34  ;;  %v397_v56 = vadd.bf16 %v2916_v27, %v2924_v38  ;;  %v415_v4 = vmul.bf16 1045249613, %v3063_v11  ;;  %v416_v2 = vmul.bf16 1045249613, %v384_v57 }
 0x1fe   :  { %v3125_v32 = vadd.f32 %v4140_v39, %v782_v5  ;;  %v794_v14 = vrot.slane %v793_v51, 1  ;;  %v398_v52 = vadd.bf16 %v2912_v18, %v2941_v17  ;;  %v417_v42 = vmul.bf16 1045249613, %v385_v41 }
 0x1ff   :  { %v418_v48 = vmul.bf16 1045249613, %v386_v31  ;;  %v419_v37 = vmul.bf16 1045249613, %v387_v1  ;;  %v420_v61 = vmul.bf16 1045249613, %v388_v53  ;;  %v447_v19 = vmax.bf16 %v415_v4, %v3063_v11 }
 0x200   :  { %v891_v8 = vrot.slane %v3125_v32, 2  ;;  %v795_v33 = vadd.f32 %v794_v14, %v793_v51  ;;  %v421_v43 = vmul.bf16 1045249613, %v389_v40  ;;  %v422_v20 = vmul.bf16 1045249613, %v390_v59 }
 0x201   :  { %v423_v60 = vmul.bf16 1045249613, %v391_v30  ;;  %v424_v28 = vmul.bf16 1045249613, %v392_v3  ;;  %v4141_v6 = vrot.slane %v2914_v26, 7  ;;  %v448_v10 = vmax.bf16 %v416_v2, %v384_v57 }
 0x202   :  { %v425_v38 = vmul.bf16 1045249613, %v393_v50  ;;  %v426_v58 = vmul.bf16 1045249613, %v394_v0  ;;  %v427_v35 = vmul.bf16 1045249613, %v395_v12  ;;  %v892_v13 = vsel %vm876_vm7, %v891_v8, %v890_v47 }
 0x203   :  { %v3140_v27 = vadd.f32 %v4141_v6, %v795_v33  ;;  %v428_v63 = vmul.bf16 1045249613, %v396_v55  ;;  %v429_v18 = vmul.bf16 1045249613, %v397_v56  ;;  %v430_v17 = vmul.bf16 1045249613, %v398_v52 }
 0x204   :  { %v449_v9 = vmax.bf16 %v417_v42, %v385_v41  ;;  %v450_v15 = vmax.bf16 %v418_v48, %v386_v31  ;;  %v451_v54 = vmax.bf16 %v419_v37, %v387_v1  ;;  %v452_v24 = vmax.bf16 %v420_v61, %v388_v53 }
 0x205   :  { %v893_v23 = vrot.slane %v3140_v27, 1  ;;  %v453_v21 = vmax.bf16 %v421_v43, %v389_v40  ;;  %v454_v34 = vmax.bf16 %v422_v20, %v390_v59  ;;  %v455_v5 = vmax.bf16 %v423_v60, %v391_v30 }
 0x206   :  { %v456_v45 = vmax.bf16 %v424_v28, %v392_v3  ;;  %v457_v39 = vmax.bf16 %v425_v38, %v393_v50  ;;  %v458_v47 = vmax.bf16 %v426_v58, %v394_v0  ;;  %v459_v14 = vmax.bf16 %v427_v35, %v395_v12 }
 0x207   :  { %v894_v36 = vsel %vm879_vm8, %v893_v23, %v892_v13  ;;  %v460_v8 = vmax.bf16 %v428_v63, %v396_v55  ;;  %v461_v33 = vmax.bf16 %v429_v18, %v397_v56  ;;  %v462_v11 = vmax.bf16 %v430_v17, %v398_v52 }
 0x208   :  { %v900_v51 = vsel %vm587_vm1, %v894_v36, -inf  ;;  %v491_v57 = vmul.bf16 %v2863_v46, %v447_v19  ;;  %v492_v41 = vmul.bf16 %v2867_v49, %v448_v10  ;;  %v493_v31 = vmul.bf16 %v2863_v46, %v449_v9 }
 0x209   :  { %901 = vmax.xlane.f32.xlu0 %v900_v51  ;;  %v494_v1 = vmul.bf16 %v2867_v49, %v450_v15  ;;  %v495_v53 = vmul.bf16 %v2863_v46, %v451_v54  ;;  %v3153_v40 = vmul.bf16 %v2867_v49, %v452_v24  ;;  %v497_v59 = vmul.bf16 %v2863_v46, %v453_v21 }
 0x20a   :  { %v3157_v30 = vmul.bf16 %v2867_v49, %v454_v34  ;;  %v3160_v3 = vmul.bf16 %v2863_v46, %v455_v5  ;;  %v3163_v50 = vmul.bf16 %v2867_v49, %v456_v45  ;;  %v3166_v0 = vmul.bf16 %v2863_v46, %v457_v39 }
 0x20b   :  { %v3169_v12 = vmul.bf16 %v2867_v49, %v458_v47  ;;  %v3172_v55 = vmul.bf16 %v2863_v46, %v459_v14  ;;  %v3175_v56 = vmul.bf16 %v2867_v49, %v460_v8  ;;  %v3178_v4 = vmul.bf16 %v2863_v46, %v461_v33 }
 0x20c   :  { %v3181_v2 = vmul.bf16 %v2867_v49, %v462_v11  ;;  %v523_v52 = vunpack.c.l.bf16 %v491_v57  ;;  %v524_v42 = vunpack.c.h.bf16 %v491_v57  ;;  %v525_v48 = vunpack.c.l.bf16 %v492_v41 }
 0x20d   :  { %v526_v37 = vunpack.c.h.bf16 %v492_v41  ;;  %v527_v61 = vunpack.c.l.bf16 %v493_v31  ;;  %v528_v43 = vunpack.c.h.bf16 %v493_v31  ;;  %v529_v20 = vunpack.c.l.bf16 %v494_v1 }
 0x20e   :  { %v530_v60 = vunpack.c.h.bf16 %v494_v1  ;;  %v531_v28 = vunpack.c.l.bf16 %v495_v53  ;;  %v532_v6 = vunpack.c.h.bf16 %v495_v53  ;;  %v533_v38 = vunpack.c.l.bf16 %v3153_v40 }
 0x20f   :  { %v534_v58 = vunpack.c.h.bf16 %v3153_v40  ;;  %v535_v35 = vunpack.c.l.bf16 %v497_v59  ;;  %v536_v46 = vunpack.c.h.bf16 %v497_v59  ;;  %v537_v13 = vunpack.c.l.bf16 %v3157_v30 }
 0x210   :  { %v538_v49 = vunpack.c.h.bf16 %v3157_v30  ;;  %v539_v63 = vunpack.c.l.bf16 %v3160_v3  ;;  %v540_v18 = vunpack.c.h.bf16 %v3160_v3  ;;  %v541_v17 = vunpack.c.l.bf16 %v3163_v50 }
 0x211   :  { %v542_v23 = vunpack.c.h.bf16 %v3163_v50  ;;  %v543_v19 = vunpack.c.l.bf16 %v3166_v0  ;;  %v544_v10 = vunpack.c.h.bf16 %v3166_v0  ;;  %v545_v9 = vunpack.c.l.bf16 %v3169_v12 }
 0x212   :  { %v546_v15 = vunpack.c.h.bf16 %v3169_v12  ;;  %v547_v54 = vunpack.c.l.bf16 %v3172_v55  ;;  %v548_v24 = vunpack.c.h.bf16 %v3172_v55  ;;  %v549_v21 = vunpack.c.l.bf16 %v3175_v56 }
 0x213   :  { %v550_v36 = vunpack.c.h.bf16 %v3175_v56  ;;  %v551_v34 = vunpack.c.l.bf16 %v3178_v4  ;;  %v552_v5 = vunpack.c.h.bf16 %v3178_v4  ;;  %v553_v45 = vunpack.c.l.bf16 %v3181_v2 }
 0x214   :  { %v588_v51 = vsel %vm587_vm1, %v523_v52, 0.0  ;;  %v589_v39 = vsel %vm587_vm1, %v524_v42, 0.0  ;;  %v554_v47 = vunpack.c.h.bf16 %v3181_v2  ;;  %v591_v8 = vsel %vm587_vm1, %v525_v48, 0.0 }
 0x215   :  { %v590_v14 = vadd.f32 %v589_v39, %v588_v51  ;;  %v601_v33 = vsel %vm587_vm1, %v527_v61, 0.0  ;;  %v593_v11 = vsel %vm587_vm1, %v526_v37, 0.0  ;;  %v602_v57 = vsel %vm587_vm1, %v528_v43, 0.0 }
 0x216   :  { %v604_v41 = vsel %vm587_vm1, %v529_v20, 0.0  ;;  %v614_v31 = vsel %vm587_vm1, %v531_v28, 0.0  ;;  %v603_v53 = vadd.f32 %v602_v57, %v601_v33  ;;  %v615_v40 = vsel %vm587_vm1, %v532_v6, 0.0 }
 0x217   :  { %v592_v1 = vadd.f32 %v591_v8, %v590_v14  ;;  %v617_v59 = vsel %vm587_vm1, %v533_v38, 0.0  ;;  %v606_v30 = vsel %vm587_vm1, %v530_v60, 0.0  ;;  %v616_v3 = vadd.f32 %v615_v40, %v614_v31 }
 0x218   :  { %v627_v50 = vsel %vm587_vm1, %v535_v35, 0.0  ;;  %v628_v0 = vsel %vm587_vm1, %v536_v46, 0.0  ;;  %v605_v52 = vadd.f32 %v604_v41, %v603_v53  ;;  %v630_v48 = vsel %vm587_vm1, %v537_v13, 0.0 }
 0x219   :  { %v594_v55 = vadd.f32 %v593_v11, %v592_v1  ;;  %v629_v42 = vadd.f32 %v628_v0, %v627_v50  ;;  %v618_v37 = vadd.f32 %v617_v59, %v616_v3  ;;  %v619_v61 = vsel %vm587_vm1, %v534_v58, 0.0 }
 0x21a   :  { %v640_v43 = vsel %vm587_vm1, %v539_v63, 0.0  ;;  %v641_v20 = vsel %vm587_vm1, %v540_v18, 0.0  ;;  %v607_v6 = vadd.f32 %v606_v30, %v605_v52  ;;  %v632_v35 = vsel %vm587_vm1, %v538_v49, 0.0 }
 0x21b   :  { %v595_v28 = vrot.slane %v594_v55, 4  ;;  %v631_v60 = vadd.f32 %v630_v48, %v629_v42  ;;  %v642_v38 = vadd.f32 %v641_v20, %v640_v43  ;;  %v620_v51 = vadd.f32 %v619_v61, %v618_v37 }
 0x21c   :  { %v643_v46 = vsel %vm587_vm1, %v541_v17, 0.0  ;;  %v653_v39 = vsel %vm587_vm1, %v543_v19, 0.0  ;;  %v608_v13 = vrot.slane %v607_v6, 4  ;;  %v645_v63 = vsel %vm587_vm1, %v542_v23, 0.0 }
 0x21d   :  { %v596_v14 = vadd.f32 %v595_v28, %v594_v55  ;;  %v633_v8 = vadd.f32 %v632_v35, %v631_v60  ;;  %v644_v33 = vadd.f32 %v643_v46, %v642_v38  ;;  %v621_v58 = vrot.slane %v620_v51, 4 }
 0x21e   :  { %v654_v18 = vsel %vm587_vm1, %v544_v10, 0.0  ;;  %v656_v11 = vsel %vm587_vm1, %v545_v9, 0.0  ;;  %v609_v41 = vadd.f32 %v608_v13, %v607_v6  ;;  %v666_v17 = vsel %vm587_vm1, %v547_v54, 0.0 }
 0x21f   :  { %v597_v57 = vrot.slane %v596_v14, 2  ;;  %v634_v31 = vrot.slane %v633_v8, 4  ;;  %v646_v1 = vadd.f32 %v645_v63, %v644_v33  ;;  %v622_v49 = vadd.f32 %v621_v58, %v620_v51 }
 0x220   :  { %v655_v53 = vadd.f32 %v654_v18, %v653_v39  ;;  %v667_v19 = vsel %vm587_vm1, %v548_v24, 0.0  ;;  %v610_v59 = vrot.slane %v609_v41, 2  ;;  %v669_v10 = vsel %vm587_vm1, %v549_v21, 0.0 }
 0x221   :  { %v598_v40 = vadd.f32 %v597_v57, %v596_v14  ;;  %v635_v30 = vadd.f32 %v634_v31, %v633_v8  ;;  %v647_v3 = vrot.slane %v646_v1, 4  ;;  %v623_v50 = vrot.slane %v622_v49, 2 }
 0x222   :  { %v657_v23 = vadd.f32 %v656_v11, %v655_v53  ;;  %v668_v0 = vadd.f32 %v667_v19, %v666_v17  ;;  %v611_v9 = vadd.f32 %v610_v59, %v609_v41  ;;  %v658_v42 = vsel %vm587_vm1, %v546_v15, 0.0 }
 0x223   :  { %v636_v55 = vrot.slane %v635_v30, 2  ;;  %v648_v52 = vadd.f32 %v647_v3, %v646_v1  ;;  %v599_v48 = vrot.slane %v598_v40, 1  ;;  %v624_v54 = vadd.f32 %v623_v50, %v622_v49 }
 0x224   :  { %v659_v37 = vadd.f32 %v658_v42, %v657_v23  ;;  %v670_v24 = vadd.f32 %v669_v10, %v668_v0  ;;  %v612_v61 = vrot.slane %v611_v9, 1  ;;  %v671_v28 = vsel %vm587_vm1, %v550_v36, 0.0 }
 0x225   :  { %v637_v43 = vadd.f32 %v636_v55, %v635_v30  ;;  %v649_v20 = vrot.slane %v648_v52, 2  ;;  %v625_v6 = vrot.slane %v624_v54, 1  ;;  %v679_v12 = vsel %vm587_vm1, %v551_v34, 0.0 }
 0x226   :  { %v660_v21 = vrot.slane %v659_v37, 4  ;;  %v672_v60 = vadd.f32 %v671_v28, %v670_v24  ;;  %v613_v38 = vadd.f32 %v612_v61, %v611_v9  ;;  %v680_v35 = vsel %vm587_vm1, %v552_v5, 0.0 }
 0x227   :  { %v638_v15 = vrot.slane %v637_v43, 1  ;;  %v650_v51 = vadd.f32 %v649_v20, %v648_v52  ;;  %v626_v46 = vadd.f32 %v625_v6, %v624_v54  ;;  %v681_v56 = vadd.f32 %v680_v35, %v679_v12 }
 0x228   :  { %v661_v39 = vadd.f32 %v660_v21, %v659_v37  ;;  %v673_v14 = vrot.slane %v672_v60, 4  ;;  %v600_v13 = vadd.f32 %v599_v48, %v598_v40  ;;  %v682_v33 = vsel %vm587_vm1, %v553_v45, 0.0 }
 0x229   :  { %v639_v36 = vadd.f32 %v638_v15, %v637_v43  ;;  %v651_v8 = vrot.slane %v650_v51, 1  ;;  %v683_v63 = vadd.f32 %v682_v33, %v681_v56  ;;  %v684_v4 = vsel %vm587_vm1, %v554_v47, 0.0 }
 0x22a   :  { %v662_v58 = vrot.slane %v661_v39, 2  ;;  %v674_v34 = vadd.f32 %v673_v14, %v672_v60  ;;  %v4142_v5 = vrot.slane %v2918_v29, 1  ;;  %v4143_v57 = vrot.slane %v2918_v29, 2 }
 0x22b   :  { %v652_v18 = vadd.f32 %v651_v8, %v650_v51  ;;  %v4144_v31 = vrot.slane %v2918_v29, 3  ;;  %v685_v53 = vadd.f32 %v684_v4, %v683_v63  ;;  %v3260_v2 = vadd.f32 %v600_v13, %v2918_v29 }
 0x22c   :  { %v3249_v11 = vadd.f32 %v4142_v5, %v613_v38  ;;  %v3253_v41 = vadd.f32 %v4143_v57, %v626_v46  ;;  %v663_v45 = vadd.f32 %v662_v58, %v661_v39  ;;  %v675_v49 = vrot.slane %v674_v34, 2 }
 0x22d   :  { %v3257_v1 = vadd.f32 %v4144_v31, %v639_v36  ;;  %v686_v59 = vrot.slane %v685_v53, 4  ;;  %v4121_v30 = vrot.slane %v2918_v29, 5  ;;  %v4145_v3 = vrot.slane %v2918_v29, 4 }
 0x22e   :  { %v860_v47 = vrot.slane %v3249_v11, 7  ;;  %v863_v17 = vrot.slane %v3253_v41, 6  ;;  %v664_v19 = vrot.slane %v663_v45, 1  ;;  %v676_v40 = vadd.f32 %v675_v49, %v674_v34 }
 0x22f   :  { %v3267_v50 = vadd.f32 %v4145_v3, %v652_v18  ;;  %v866_v0 = vrot.slane %v3257_v1, 5  ;;  %v687_v55 = vadd.f32 %v686_v59, %v685_v53  ;;  %v4120_v42 = vrot.slane %v2918_v29, 6 }
 0x230   :  { %v862_v23 = vsel %vm861_vm2, %v860_v47, %v3260_v2  ;;  %v665_v10 = vadd.f32 %v664_v19, %v663_v45  ;;  %v677_v9 = vrot.slane %v676_v40, 1  ;;  %v4119_v21 = vrot.slane %v2918_v29, 7 }
 0x231   :  { %v865_v52 = vsel %vm864_vm3, %v863_v17, %v862_v23  ;;  %v688_v54 = vrot.slane %v687_v55, 2  ;;  %v869_v61 = vrot.slane %v3267_v50, 4 }
 0x232   :  { %v678_v48 = vadd.f32 %v677_v9, %v676_v40  ;;  %v3276_v37 = vadd.f32 %v4121_v30, %v665_v10  ;;  %v868_v24 = vsel %vm867_vm4, %v866_v0, %v865_v52 }
 0x233   :  { %v689_v43 = vadd.f32 %v688_v54, %v687_v55  ;;  %v871_v28 = vsel %vm870_vm5, %v869_v61, %v868_v24 }
 0x234   :  { %v3282_v20 = vadd.f32 %v4120_v42, %v678_v48  ;;  %v872_v60 = vrot.slane %v3276_v37, 3 }
 0x235   :  { %v690_v6 = vrot.slane %v689_v43, 1 }
 0x236   :  { %v874_v38 = vsel %vm873_vm6, %v872_v60, %v871_v28  ;;  %v875_v15 = vrot.slane %v3282_v20, 2 }
 0x237   :  { %v691_v12 = vadd.f32 %v690_v6, %v689_v43 }
 0x238   :  { %v877_v35 = vsel %vm876_vm7, %v875_v15, %v874_v38 }
 0x239   :  { %v3291_v51 = vadd.f32 %v4119_v21, %v691_v12 }
 0x23b   :  { %v878_v46 = vrot.slane %v3291_v51, 1 }
 0x23d   :  { %v880_v39 = vsel %vm879_vm8, %v878_v46, %v877_v35 }
 0x23e   :  { %v897_v14 = vsel %vm587_vm1, %v880_v39, -inf }
 0x23f   :  { %898 = vmax.xlane.f32.xlu1 %v897_v14 }
 0x296   :  { %v902_v56 = vpop.xlane.xlu0 %901 }
 0x297   :  { %v912_v13 = vrot.slane %v902_v56, 1  ;;  %v913_v36 = vrot.slane %v902_v56, 2  ;;  %v914_v8 = vrot.slane %v902_v56, 3  ;;  %v915_v58 = vrot.slane %v902_v56, 4 }
 0x298   :  { %v943_v34 = vsub.f32 %v3077_v7, %v902_v56  ;;  %v916_v63 = vrot.slane %v902_v56, 5  ;;  %v917_v18 = vrot.slane %v902_v56, 6  ;;  %v918_v57 = vrot.slane %v902_v56, 7 }
 0x299   :  { %v944_v33 = vsub.f32 %v3070_v25, %v912_v13  ;;  %v945_v4 = vsub.f32 %v3074_v16, %v913_v36  ;;  %v946_v31 = vsub.f32 %v3081_v44, %v914_v8  ;;  %v947_v45 = vsub.f32 %v3087_v22, %v915_v58 }
 0x29a   :  { %v959_v49 = vpack.c.bf16 %v943_v34, %v943_v34  ;;  %v948_v53 = vsub.f32 %v3102_v62, %v916_v63  ;;  %v949_v17 = vsub.f32 %v3125_v32, %v917_v18  ;;  %v950_v19 = vsub.f32 %v3140_v27, %v918_v57 }
 0x29b   :  { %v960_v5 = vpack.c.bf16 %v944_v33, %v944_v33  ;;  %v961_v47 = vpack.c.bf16 %v945_v4, %v945_v4  ;;  %v962_v7 = vpack.c.bf16 %v946_v31, %v946_v31  ;;  %v963_v40 = vpack.c.bf16 %v947_v45, %v947_v45 }
 0x29c   :  { %v992_v59 = vmul.bf16 1069105081, %v959_v49  ;;  %v964_v16 = vpack.c.bf16 %v948_v53, %v948_v53  ;;  %v965_v3 = vpack.c.bf16 %v949_v17, %v949_v17  ;;  %v966_v0 = vpack.c.bf16 %v950_v19, %v950_v19 }
 0x29d   :  { %v995_v25 = vmul.bf16 1069105081, %v960_v5  ;;  %v998_v23 = vmul.bf16 1069105081, %v961_v47  ;;  %v1001_v44 = vmul.bf16 1069105081, %v962_v7 }
 0x29e   :  { %v1004_v10 = vmul.bf16 1069105081, %v963_v40  ;;  %v1007_v22 = vmul.bf16 1069105081, %v964_v16  ;;  %v1010_v62 = vmul.bf16 1069105081, %v965_v3 }
 0x29f   :  { %2651 = vpow.bf16 %v995_v25  ;;  %v1013_v9 = vmul.bf16 1069105081, %v966_v0 }
 0x2a0   :  { %2653 = vpow.bf16 %v992_v59 }
 0x2a1   :  { %2655 = vpow.bf16 %v998_v23 }
 0x2a2   :  { %2657 = vpow.bf16 %v1001_v44 }
 0x2a3   :  { %2659 = vpow.bf16 %v1004_v10 }
 0x2a4   :  { %2661 = vpow.bf16 %v1007_v22 }
 0x2a5   :  { %2663 = vpow.bf16 %v1010_v62 }
 0x2a6   :  { %2665 = vpow.bf16 %v1013_v9 }
 0x2aa   :  { %v3306_v28 = vpop.eup %2651 }
 0x2ab   :  { %v3315_v39 = vpop.eup %2653 }
 0x2ac   :  { %v1023_v47 = vunpack.c.l.bf16 %v3315_v39 }
 0x2cc   :  { %v899_v32 = vpop.xlane.xlu1 %898 }
 0x2cd   :  { %v905_v27 = vrot.slane %v899_v32, 1  ;;  %v906_v55 = vrot.slane %v899_v32, 2  ;;  %v907_v52 = vrot.slane %v899_v32, 3  ;;  %v908_v48 = vrot.slane %v899_v32, 4 }
 0x2ce   :  { %v935_v54 = vsub.f32 %v3260_v2, %v899_v32  ;;  %v909_v24 = vrot.slane %v899_v32, 5  ;;  %v910_v61 = vrot.slane %v899_v32, 6  ;;  %v911_v43 = vrot.slane %v899_v32, 7 }
 0x2cf   :  { %v936_v6 = vsub.f32 %v3249_v11, %v905_v27  ;;  %v937_v60 = vsub.f32 %v3253_v41, %v906_v55  ;;  %v938_v12 = vsub.f32 %v3257_v1, %v907_v52  ;;  %v939_v38 = vsub.f32 %v3267_v50, %v908_v48  ;;  %v3317_v11 = vpop.eup %2655 }
 0x2d0   :  { %v951_v15 = vpack.c.bf16 %v935_v54, %v935_v54  ;;  %v940_v35 = vsub.f32 %v3276_v37, %v909_v24  ;;  %v941_v46 = vsub.f32 %v3282_v20, %v910_v61  ;;  %v942_v2 = vsub.f32 %v3291_v51, %v911_v43  ;;  %v3320_v33 = vpop.eup %2657 }
 0x2d1   :  { %v952_v14 = vpack.c.bf16 %v936_v6, %v936_v6  ;;  %v953_v56 = vpack.c.bf16 %v937_v60, %v937_v60  ;;  %v954_v13 = vpack.c.bf16 %v938_v12, %v938_v12  ;;  %v955_v36 = vpack.c.bf16 %v939_v38, %v939_v38  ;;  %v3322_v51 = vpop.eup %2659 }
 0x2d2   :  { %v968_v41 = vmul.bf16 1069105081, %v951_v15  ;;  %v956_v8 = vpack.c.bf16 %v940_v35, %v940_v35  ;;  %v957_v1 = vpack.c.bf16 %v941_v46, %v941_v46  ;;  %v1024_v50 = vunpack.c.l.bf16 %v3306_v28  ;;  %v3324_v4 = vpop.eup %2661 }
 0x2d3   :  { %v971_v37 = vmul.bf16 1069105081, %v952_v14  ;;  %v958_v58 = vpack.c.bf16 %v942_v2, %v942_v2  ;;  %v974_v20 = vmul.bf16 1069105081, %v953_v56  ;;  %v977_v34 = vmul.bf16 1069105081, %v954_v13  ;;  %v3326_v5 = vpop.eup %2663 }
 0x2d4   :  { %2667 = vpow.bf16 %v968_v41  ;;  %v980_v63 = vmul.bf16 1069105081, %v955_v36  ;;  %v983_v18 = vmul.bf16 1069105081, %v956_v8  ;;  %v986_v57 = vmul.bf16 1069105081, %v957_v1  ;;  %v3329_v45 = vpop.eup %2665 }
 0x2d5   :  { %2669 = vpow.bf16 %v971_v37  ;;  %v1025_v31 = vunpack.c.l.bf16 %v3317_v11  ;;  %v989_v49 = vmul.bf16 1069105081, %v958_v58  ;;  %v1061_v53 = vrot.slane %v1024_v50, 7 }
 0x2d6   :  { %2671 = vpow.bf16 %v974_v20  ;;  %v1026_v25 = vunpack.c.l.bf16 %v3320_v33  ;;  %v1027_v7 = vunpack.c.l.bf16 %v3322_v51  ;;  %v1028_v44 = vunpack.c.l.bf16 %v3324_v4 }
 0x2d7   :  { %2673 = vpow.bf16 %v977_v34  ;;  %v1063_v17 = vrot.slane %v1025_v31, 6  ;;  %v1062_v19 = vsel %vm861_vm2, %v1061_v53, %v1023_v47  ;;  %v1029_v61 = vunpack.c.l.bf16 %v3326_v5 }
 0x2d8   :  { %2675 = vpow.bf16 %v980_v63  ;;  %v1065_v16 = vrot.slane %v1026_v25, 5  ;;  %v1067_v9 = vrot.slane %v1027_v7, 4  ;;  %v1069_v15 = vrot.slane %v1028_v44, 3 }
 0x2d9   :  { %2677 = vpow.bf16 %v983_v18  ;;  %v1064_v40 = vsel %vm864_vm3, %v1063_v17, %v1062_v19  ;;  %v1030_v56 = vunpack.c.l.bf16 %v3329_v45  ;;  %v1071_v58 = vrot.slane %v1029_v61, 2 }
 0x2da   :  { %2679 = vpow.bf16 %v986_v57  ;;  %v1066_v10 = vsel %vm867_vm4, %v1065_v16, %v1064_v40  ;;  %v1267_v40 = vld [vmem:[%s4093_s8] sm:$0xff]  ;;  %v1268_v16 = vld [vmem:[%s4093_s8 + $0x8] sm:$0xff] }
 0x2db   :  { %2681 = vpow.bf16 %v989_v49  ;;  %v1068_v43 = vsel %vm870_vm5, %v1067_v9, %v1066_v10  ;;  %v1073_v49 = vrot.slane %v1030_v56, 1  ;;  %v1689_v10 = vpack.c.bf16 %v1268_v16, %v1267_v40  ;;  %v1269_v9 = vld [vmem:[%s4093_s8 + $0x10] sm:$0xff] }
 0x2dc   :  { %v1070_v8 = vsel %vm873_vm6, %v1069_v15, %v1068_v43  ;;  %v4146_v43 = vmov 0.0  }
 0x2dd   :  { %v1072_v18 = vsel %vm876_vm7, %v1071_v58, %v1070_v8  ;;  %2598 = vmatprep.mubr.msk.bf16.mxu1 %vm2733_vm9, %v4146_v43 }
 0x2de   :  { %v1074_v17 = vsel %vm879_vm8, %v1073_v49, %v1072_v18 }
 0x2df   :  { %v3342_v59 = vpop.eup %2667  ;;  %v1080_v19 = vsel %vm587_vm1, %v1074_v17, 0.0 }
 0x2e0   :  { %v3346_v3 = vpop.eup %2669  ;;  %v1015_v27 = vunpack.c.l.bf16 %v3342_v59 }
 0x2e1   :  { %v3348_v23 = vpop.eup %2671  ;;  %v1016_v0 = vunpack.c.l.bf16 %v3346_v3 }
 0x2e2   :  { %v3353_v22 = vpop.eup %2673  ;;  %v1017_v62 = vunpack.c.l.bf16 %v3348_v23 }
 0x2e3   :  { %v3358_v32 = vpop.eup %2675  ;;  %v1018_v55 = vunpack.c.l.bf16 %v3353_v22  ;;  %v1047_v52 = vrot.slane %v1016_v0, 7 }
 0x2e4   :  { %v3364_v48 = vpop.eup %2677  ;;  %v1019_v54 = vunpack.c.l.bf16 %v3358_v32  ;;  %v1049_v24 = vrot.slane %v1017_v62, 6 }
 0x2e5   :  { %v3371_v6 = vpop.eup %2679  ;;  %v1020_v60 = vunpack.c.l.bf16 %v3364_v48  ;;  %v1048_v12 = vsel %vm861_vm2, %v1047_v52, %v1015_v27  ;;  %v1051_v38 = vrot.slane %v1018_v55, 5  ;;  %v1270_v52 = vld [vmem:[%s4093_s8 + $0x18] sm:$0xff] }
 0x2e6   :  { %v3381_v35 = vpop.eup %2681  ;;  %v1021_v46 = vunpack.c.l.bf16 %v3371_v6  ;;  %v1050_v2 = vsel %vm864_vm3, %v1049_v24, %v1048_v12  ;;  %v1053_v14 = vrot.slane %v1019_v54, 4  ;;  %v1690_v24 = vpack.c.bf16 %v1270_v52, %v1269_v9  ;;  %v1262_v12 = vld [vmem:[%s4094_s6] sm:$0xff] }
 0x2e7   :  { %v1022_v13 = vunpack.c.l.bf16 %v3381_v35  ;;  %v1052_v36 = vsel %vm867_vm4, %v1051_v38, %v1050_v2  ;;  %v1055_v41 = vrot.slane %v1020_v60, 3  ;;  %v1263_v38 = vld [vmem:[%s4094_s6 + $0x8] sm:$0xff] }
 0x2e8   :  { %v1054_v1 = vsel %vm870_vm5, %v1053_v14, %v1052_v36  ;;  %v1057_v37 = vrot.slane %v1021_v46, 2  ;;  %v2630_v15 = vpack.c.bf16 %v1263_v38, %v1262_v12 }
 0x2e9   :  { %v1056_v20 = vsel %vm873_vm6, %v1055_v41, %v1054_v1  ;;  %v1059_v34 = vrot.slane %v1022_v13, 1 }
 0x2ea   :  { %v1058_v63 = vsel %vm876_vm7, %v1057_v37, %v1056_v20  ;;  %2631 = vmatprep.subr.bf16.mxu0 %v2630_v15 }
 0x2eb   :  { %v1060_v57 = vsel %vm879_vm8, %v1059_v34, %v1058_v63  ;;  %2633 = vmatpush3.bf16.msra.mxu0 %v2630_v15 }
 0x2ec   :  { %v1077_v53 = vsel %vm587_vm1, %v1060_v57, 0.0 }
 0x2ed   :  { %1078 = vadd.xlane.f32.xlu1 %v1077_v53 }
 0x2f1   :  { %1081 = vadd.xlane.f32.xlu1 %v1080_v19 }
 0x302   :  { %1693 = vperm.xlu1 %2650, %v1689_v10  }
 0x306   :  { %1698 = vperm.xlu1 %2650, %v1690_v24  }
 0x37a   :  { %v1079_v2 = vpop.xlane.xlu1 %1078 }
 0x37b   :  { %2683 = vrcp.f32 %v1079_v2 }
 0x37e   :  { %v1082_v14 = vpop.xlane.xlu1 %1081 }
 0x37f   :  { %2685 = vrcp.f32 %v1082_v14 }
 0x385   :  { %v2684_v36 = vpop.eup %2683 }
 0x386   :  { %v1087_v41 = vrot.slane %v2684_v36, 1  ;;  %v1088_v8 = vrot.slane %v2684_v36, 2  ;;  %v1089_v1 = vrot.slane %v2684_v36, 3  ;;  %v1090_v37 = vrot.slane %v2684_v36, 4 }
 0x387   :  { %v1091_v58 = vrot.slane %v2684_v36, 5  ;;  %v1092_v20 = vrot.slane %v2684_v36, 6  ;;  %v1093_v63 = vrot.slane %v2684_v36, 7  ;;  %v1117_v18 = vmul.f32 %v2684_v36, %v1015_v27 }
 0x388   :  { %v1118_v57 = vmul.f32 %v1087_v41, %v1016_v0  ;;  %v1119_v49 = vmul.f32 %v1088_v8, %v1017_v62  ;;  %v1120_v52 = vmul.f32 %v1089_v1, %v1018_v55  ;;  %v1121_v59 = vmul.f32 %v1090_v37, %v1019_v54 }
 0x389   :  { %v2686_v34 = vpop.eup %2685  ;;  %v1122_v3 = vmul.f32 %v1091_v58, %v1020_v60  ;;  %v1123_v62 = vmul.f32 %v1092_v20, %v1021_v46  ;;  %v1124_v27 = vmul.f32 %v1093_v63, %v1022_v13 }
 0x38a   :  { %v1094_v53 = vrot.slane %v2686_v34, 1  ;;  %v1095_v17 = vrot.slane %v2686_v34, 2  ;;  %v1096_v19 = vrot.slane %v2686_v34, 3  ;;  %v1097_v40 = vrot.slane %v2686_v34, 4 }
 0x38b   :  { %v1098_v16 = vrot.slane %v2686_v34, 5  ;;  %v1099_v10 = vrot.slane %v2686_v34, 6  ;;  %v1100_v9 = vrot.slane %v2686_v34, 7  ;;  %v1134_v32 = vpack.c.bf16 %v1118_v57, %v1118_v57 }
 0x38c   :  { %v1126_v23 = vmul.f32 %v1094_v53, %v1024_v50  ;;  %v1127_v0 = vmul.f32 %v1095_v17, %v1025_v31  ;;  %v1128_v22 = vmul.f32 %v1096_v19, %v1026_v25  ;;  %v1125_v55 = vmul.f32 %v2686_v34, %v1023_v47 }
 0x38d   :  { %v1129_v28 = vmul.f32 %v1097_v40, %v1027_v7  ;;  %v1130_v11 = vmul.f32 %v1098_v16, %v1028_v44  ;;  %v1135_v50 = vpack.c.bf16 %v1119_v49, %v1119_v49  ;;  %v1131_v31 = vmul.f32 %v1099_v10, %v1029_v61 }
 0x38e   :  { %v1132_v48 = vmul.f32 %v1100_v9, %v1030_v56  ;;  %v1136_v54 = vpack.c.bf16 %v1120_v52, %v1120_v52  ;;  %v1142_v33 = vpack.c.bf16 %v1126_v23, %v1126_v23  ;;  %v1133_v25 = vpack.c.bf16 %v1117_v18, %v1117_v18 }
 0x38f   :  { %v1137_v6 = vpack.c.bf16 %v1121_v59, %v1121_v59  ;;  %v1138_v60 = vpack.c.bf16 %v1122_v3, %v1122_v3  ;;  %v1143_v39 = vpack.c.bf16 %v1127_v0, %v1127_v0  ;;  %v1139_v47 = vpack.c.bf16 %v1123_v62, %v1123_v62 }
 0x390   :  { %v1140_v35 = vpack.c.bf16 %v1124_v27, %v1124_v27  ;;  %v1144_v51 = vpack.c.bf16 %v1128_v22, %v1128_v22  ;;  %v1172_v7 = vunpack.c.l.b16 %v1134_v32  ;;  %v1141_v46 = vpack.c.bf16 %v1125_v55, %v1125_v55 }
 0x391   :  { %v1145_v4 = vpack.c.bf16 %v1129_v28, %v1129_v28  ;;  %v1146_v44 = vpack.c.bf16 %v1130_v11, %v1130_v11  ;;  %v1173_v13 = vunpack.c.l.b16 %v1135_v50  ;;  %v1147_v24 = vpack.c.bf16 %v1131_v31, %v1131_v31 }
 0x392   :  { %v1148_v5 = vpack.c.bf16 %v1132_v48, %v1132_v48  ;;  %v1174_v61 = vunpack.c.l.b16 %v1136_v54  ;;  %v1180_v12 = vunpack.c.l.b16 %v1142_v33  ;;  %v1171_v45 = vunpack.c.l.b16 %v1133_v25  ;;  %v1264_v33 = vld [vmem:[%s4094_s6 + $0x10] sm:$0xff]  ;;  %v1265_v25 = vld [vmem:[%s4094_s6 + $0x18] sm:$0xff] }
 0x393   :  { %v1175_v56 = vunpack.c.l.b16 %v1137_v6  ;;  %v1176_v38 = vunpack.c.l.b16 %v1138_v60  ;;  %v1181_v15 = vunpack.c.l.b16 %v1143_v39  ;;  %v1177_v2 = vunpack.c.l.b16 %v1139_v47  ;;  %v2558_v60 = vld [vmem:[%s4095_s5] ss:$0 sm:$0xff] }
 0x394   :  { %v1182_v14 = vunpack.c.l.b16 %v1144_v51  ;;  %v1187_v36 = vrot.slane %v1172_v7, 7  ;;  %v1189_v41 = vrot.slane %v1173_v13, 6  ;;  %v1178_v8 = vunpack.c.l.b16 %v1140_v35 }
 0x395   :  { %v1179_v1 = vunpack.c.l.b16 %v1141_v46  ;;  %v1183_v37 = vunpack.c.l.b16 %v1145_v4  ;;  %v1184_v58 = vunpack.c.l.b16 %v1146_v44  ;;  %v1191_v34 = vrot.slane %v1174_v61, 5  ;;  %v2560_v44 = vld [vmem:[%s4096_s7] ss:$0 sm:$0xff] }
 0x396   :  { %v1188_v20 = vsel %vm861_vm2, %v1187_v36, %v1171_v45  ;;  %v1201_v63 = vrot.slane %v1180_v12, 7  ;;  %v1203_v18 = vrot.slane %v1181_v15, 6  ;;  %v1185_v57 = vunpack.c.l.b16 %v1147_v24  ;;  %v4148_v15 = vld [vmem:[#allocation3_spill] sm:$0xff] }
 0x397   :  { %v1186_v49 = vunpack.c.l.b16 %v1148_v5  ;;  %v1190_v53 = vsel %vm864_vm3, %v1189_v41, %v1188_v20  ;;  %v1193_v17 = vrot.slane %v1175_v56, 4  ;;  %v1195_v40 = vrot.slane %v1176_v38, 3  ;;  %v4147_v56 = vld [vmem:[#allocation2_spill] sm:$0xff]  ;;  %v4152_v20 = vld [vmem:[#allocation4_spill] sm:$0xff] }
 0x398   :  { %v1192_v19 = vsel %vm867_vm4, %v1191_v34, %v1190_v53  ;;  %v1202_v16 = vsel %vm861_vm2, %v1201_v63, %v1179_v1  ;;  %v1205_v10 = vrot.slane %v1182_v14, 5  ;;  %v1197_v52 = vrot.slane %v1177_v2, 2  ;;  %v4149_v14 = vld [vmem:[#allocation5_spill] sm:$0xff]  ;;  %v4150_v41 = vld [vmem:[#allocation6_spill] sm:$0xff] }
 0x399   :  { %v1194_v9 = vsel %vm870_vm5, %v1193_v17, %v1192_v19  ;;  %v1204_v59 = vsel %vm864_vm3, %v1203_v18, %v1202_v16  ;;  %v1207_v3 = vrot.slane %v1183_v37, 4  ;;  %v1209_v62 = vrot.slane %v1184_v58, 3  ;;  %v4151_v37 = vld [vmem:[#allocation7_spill] sm:$0xff]  ;;  %v4153_v18 = vld [vmem:[#allocation8_spill] sm:$0xff] }
 0x39a   :  { %v1196_v23 = vsel %vm873_vm6, %v1195_v40, %v1194_v9  ;;  %v1206_v0 = vsel %vm867_vm4, %v1205_v10, %v1204_v59  ;;  %v1211_v32 = vrot.slane %v1185_v57, 2  ;;  %v1199_v55 = vrot.slane %v1178_v8, 1  ;;  %v4154_v40 = vld [vmem:[#allocation9_spill] sm:$0xff] }
 0x39b   :  { %v1198_v27 = vsel %vm876_vm7, %v1197_v52, %v1196_v23  ;;  %v1208_v22 = vsel %vm870_vm5, %v1207_v3, %v1206_v0  ;;  %v1213_v11 = vrot.slane %v1186_v49, 1  ;;  %v2634_v6 = vpack.c.bf16 %v1265_v25, %v1264_v33  ;;  %v3508_v3 = vpop.permute.xlu1 %1693 }
 0x39c   :  { %v1210_v28 = vsel %vm873_vm6, %v1209_v62, %v1208_v22  ;;  %v1200_v31 = vsel %vm879_vm8, %v1199_v55, %v1198_v27 }
 0x39d   :  { %v1212_v50 = vsel %vm876_vm7, %v1211_v32, %v1210_v28  ;;  %2635 = vmatprep.subr.bf16.mxu0 %v2634_v6 }
 0x39e   :  { %v1214_v48 = vsel %vm879_vm8, %v1213_v11, %v1212_v50  ;;  %2637 = vmatpush3.bf16.msra.mxu0 %v2634_v6 }
 0x39f   :  { %v1215_v54 = vpack.c.b16 %v1214_v48, %v1200_v31  ;;  %v3510_v23 = vpop.permute.xlu1 %1698 }
 0x3a1   :  { %2599 = vmatmul.mubr.msk.bf16.vlgmr.msra.gmra.mrb[0].mxu1 %vm587_vm1, %v1215_v54 }
 0x3a2   :  { %2615 = vmatprep.mubr.msk.bf16.mxu1 %vm2733_vm9, %v4146_v43 }
 0x474   :  { %v1253_v39 = vpop.f32.mrb[0].mxu1 }
 0x475   :  { %v1254_v47 = vadd.f32 %v2558_v60, %v1253_v39  ;;  %v2600_v35 = vpop.f32.mrb[1].mxu1 }
 0x476   :  { %v1256_v51 = vpop.f32.mrb[2].mxu1 }
 0x477   :  { %v1260_v43 = vmax.f32 %v1254_v47, 0.0  ;;  %v1257_v7 = vadd.f32 %v2558_v60, %v1256_v51  ;;  %v2601_v46 = vpop.f32.mrb[3].mxu1 }
 0x479   :  { %v1261_v4 = vmax.f32 %v1257_v7, 0.0  ;;  %2610 = vmatprep.mubr.msk.f32.mxu0 %vm1278_vm10, %v1260_v43 }
 0x47b   :  { %2611 = vmatmul.mubr.msk.f32.vlgmr.msra.gmra.mrb[2].mxu0 %vm1278_vm10, %v1261_v4 }
 0x54e   :  { %v2612_v13 = vpop.f32.mrb[2].mxu0 }
 0x54f   :  { %v1357_v24 = vadd.f32 %v2612_v13, %v2560_v44  ;;  %v1351_v5 = vpop.f32.mrb[3].mxu0 }
 0x550   :  { %v1352_v61 = vadd.f32 %v2560_v44, %v1351_v5 }
 0x552   :  { %v1394_v12 = vpack.c.bf16 %v1357_v24, %v1352_v61 }
 0x554   :  { %v1396_v45 = vpack.i.b16 %v1394_v12, %v1394_v12  ;;  %2614 = vmatpush3.bf16.msra.mxu1 %v1394_v12  ;;  %v1410_v1 = vshrl.u32 %v1394_v12, 16 }
 0x556   :  { %v1524_v38 = vrot.slane %v1396_v45, %v4147_v56  ;;  %v1428_v2 = vrot.slane %v1396_v45, %v4148_v15  ;;  %v1401_v36 = vrot.slane %v1396_v45, %v4149_v14  ;;  %v1452_v8 = vrot.slane %v1396_v45, %v4150_v41 }
 0x557   :  { %v1548_v58 = vrot.slane %v1396_v45, %v4151_v37  ;;  %v1500_v34 = vrot.slane %v1396_v45, %v4152_v20  ;;  %v1411_v63 = vpack.i.b16 %v1410_v1, %v1410_v1  ;;  %v1476_v57 = vrot.slane %v1396_v45, %v4153_v18 }
 0x558   :  { %1531 = vbcast.lane.c.b16.xlu0 %v1524_v38, 304  ;;  %1431 = vbcast.lane.c.b16.xlu1 %v1428_v2, 288  ;;  %v1572_v16 = vrot.slane %v1396_v45, %v4154_v40 }
 0x559   :  { %v1440_v49 = vrot.slane %v1411_v63, %v4148_v15  ;;  %v1464_v53 = vrot.slane %v1411_v63, %v4150_v41  ;;  %v1536_v17 = vrot.slane %v1411_v63, %v4147_v56  ;;  %v1560_v19 = vrot.slane %v1411_v63, %v4151_v37 }
 0x55a   :  { %v1488_v10 = vrot.slane %v1411_v63, %v4153_v18  ;;  %v1416_v9 = vrot.slane %v1411_v63, %v4149_v14  ;;  %v1512_v52 = vrot.slane %v1411_v63, %v4152_v20  ;;  %v1584_v59 = vrot.slane %v1411_v63, %v4154_v40 }
 0x55c   :  { %1527 = vbcast.lane.c.b16.xlu1 %v1524_v38, 288  ;;  %1408 = vbcast.lane.c.b16.xlu0 %v1401_v36, 304 }
 0x560   :  { %1459 = vbcast.lane.c.b16.xlu0 %v1452_v8, 304  ;;  %1404 = vbcast.lane.c.b16.xlu1 %v1401_v36, 288 }
 0x564   :  { %1555 = vbcast.lane.c.b16.xlu0 %v1548_v58, 304  ;;  %1503 = vbcast.lane.c.b16.xlu1 %v1500_v34, 288 }
 0x568   :  { %1483 = vbcast.lane.c.b16.xlu0 %v1476_v57, 304  ;;  %1435 = vbcast.lane.c.b16.xlu1 %v1428_v2, 304 }
 0x56c   :  { %1443 = vbcast.lane.c.b16.xlu0 %v1440_v49, 288  ;;  %1455 = vbcast.lane.c.b16.xlu1 %v1452_v8, 288 }
 0x570   :  { %1467 = vbcast.lane.c.b16.xlu0 %v1464_v53, 288  ;;  %1551 = vbcast.lane.c.b16.xlu1 %v1548_v58, 288 }
 0x574   :  { %1543 = vbcast.lane.c.b16.xlu0 %v1536_v17, 304  ;;  %1507 = vbcast.lane.c.b16.xlu1 %v1500_v34, 304 }
 0x578   :  { %1471 = vbcast.lane.c.b16.xlu0 %v1464_v53, 304  ;;  %1479 = vbcast.lane.c.b16.xlu1 %v1476_v57, 288 }
 0x57c   :  { %1567 = vbcast.lane.c.b16.xlu0 %v1560_v19, 304  ;;  %1575 = vbcast.lane.c.b16.xlu1 %v1572_v16, 288 }
 0x580   :  { %1495 = vbcast.lane.c.b16.xlu0 %v1488_v10, 304  ;;  %1579 = vbcast.lane.c.b16.xlu1 %v1572_v16, 304 }
 0x584   :  { %1419 = vbcast.lane.c.b16.xlu1 %v1416_v9, 288 }
 0x588   :  { %1515 = vbcast.lane.c.b16.xlu1 %v1512_v52, 288 }
 0x58c   :  { %1423 = vbcast.lane.c.b16.xlu1 %v1416_v9, 304 }
 0x590   :  { %1519 = vbcast.lane.c.b16.xlu1 %v1512_v52, 304 }
 0x594   :  { %1539 = vbcast.lane.c.b16.xlu1 %v1536_v17, 288 }
 0x598   :  { %1447 = vbcast.lane.c.b16.xlu1 %v1440_v49, 304 }
 0x59c   :  { %1563 = vbcast.lane.c.b16.xlu1 %v1560_v19, 288 }
 0x59e   :  { %1360 = vxpose.xlu0.b32.start [1/2] (short) (narrow) %v1352_v61, 32 }
 0x5a0   :  { %1491 = vbcast.lane.c.b16.xlu1 %v1488_v10, 288 }
 0x5a2   :  { %1361 = vxpose.xlu0.b32.end [2/2] (short) (narrow) %v1357_v24, 32 }
 0x5a4   :  { %1587 = vbcast.lane.c.b16.xlu1 %v1584_v59, 288 }
 0x5a8   :  { %1591 = vbcast.lane.c.b16.xlu1 %v1584_v59, 304 }
 0x5ca   :  { %v1432_v0 = vpop.permute.xlu1 %1431  ;;  %v3518_v55 = vpop.permute.xlu0 %1531 }
 0x5ce   :  { %v3512_v62 = vpop.permute.xlu1 %1527  ;;  %v1409_v50 = vpop.permute.xlu0 %1408 }
 0x5d2   :  { %v1405_v27 = vpop.permute.xlu1 %1404  ;;  %v1460_v48 = vpop.permute.xlu0 %1459 }
 0x5d6   :  { %v3514_v22 = vpop.permute.xlu1 %1503  ;;  %v3526_v25 = vpop.permute.xlu0 %1555 }
 0x5da   :  { %v3516_v32 = vpop.permute.xlu1 %1435  ;;  %v1484_v60 = vpop.permute.xlu0 %1483 }
 0x5de   :  { %v1456_v28 = vpop.permute.xlu1 %1455  ;;  %v1444_v47 = vpop.permute.xlu0 %1443 }
 0x5e2   :  { %v3520_v11 = vpop.permute.xlu1 %1551  ;;  %v1468_v51 = vpop.permute.xlu0 %1467 }
 0x5e6   :  { %v3522_v31 = vpop.permute.xlu1 %1507  ;;  %v3532_v7 = vpop.permute.xlu0 %1543 }
 0x5ea   :  { %v1480_v54 = vpop.permute.xlu1 %1479  ;;  %v1472_v4 = vpop.permute.xlu0 %1471 }
 0x5ee   :  { %v3524_v33 = vpop.permute.xlu1 %1575  ;;  %v3538_v13 = vpop.permute.xlu0 %1567 }
 0x5f2   :  { %v3528_v6 = vpop.permute.xlu1 %1579  ;;  %v1496_v5 = vpop.permute.xlu0 %1495 }
 0x5f6   :  { %v1420_v39 = vpop.permute.xlu1 %1419 }
 0x5fa   :  { %v3530_v35 = vpop.permute.xlu1 %1515 }
 0x5fe   :  { %v1424_v43 = vpop.permute.xlu1 %1423 }
 0x602   :  { %v3534_v46 = vpop.permute.xlu1 %1519 }
 0x606   :  { %v3536_v44 = vpop.permute.xlu1 %1539 }
 0x60a   :  { %v1448_v24 = vpop.permute.xlu1 %1447 }
 0x60e   :  { %v3540_v12 = vpop.permute.xlu1 %1563 }
 0x612   :  { %v1492_v38 = vpop.permute.xlu1 %1491 }
 0x61e   :  { %v1376_v61 = vpop.trf.xlu0 }
 0x622   :  { %v1377_v45 = vpop.trf.xlu0 }
 0x623   :  { %v3542_v56 = vpack.c.bf16 %v1377_v45, %v1376_v61 }
 0x625   :  { %v1593_v15 = vadd.bf16 %v1405_v27, %v3542_v56  ;;  %v1595_v2 = vadd.bf16 %v1420_v39, %v3542_v56  ;;  %v1597_v14 = vadd.bf16 %v1432_v0, %v3542_v56  ;;  %v1599_v36 = vadd.bf16 %v1444_v47, %v3542_v56 }
 0x626   :  { %v1378_v41 = vpop.trf.xlu0  ;;  %v1601_v8 = vadd.bf16 %v1456_v28, %v3542_v56  ;;  %v1603_v1 = vadd.bf16 %v1468_v51, %v3542_v56  ;;  %v1605_v37 = vadd.bf16 %v1480_v54, %v3542_v56  ;;  %v1607_v58 = vadd.bf16 %v1492_v38, %v3542_v56 }
 0x627   :  { %v1625_v20 = vmul.bf16 1045249613, %v1593_v15  ;;  %v1627_v34 = vmul.bf16 1045249613, %v1595_v2  ;;  %v1629_v63 = vmul.bf16 1045249613, %v1597_v14 }
 0x628   :  { %v1631_v18 = vmul.bf16 1045249613, %v1599_v36  ;;  %v1633_v57 = vmul.bf16 1045249613, %v1601_v8  ;;  %v1635_v49 = vmul.bf16 1045249613, %v1603_v1 }
 0x629   :  { %v1637_v53 = vmul.bf16 1045249613, %v1605_v37  ;;  %v1639_v17 = vmul.bf16 1045249613, %v1607_v58  ;;  %v1657_v19 = vmax.bf16 %v1625_v20, %v1593_v15  ;;  %v1659_v40 = vmax.bf16 %v1627_v34, %v1595_v2 }
 0x62a   :  { %v1379_v16 = vpop.trf.xlu0  ;;  %v1661_v10 = vmax.bf16 %v1629_v63, %v1597_v14  ;;  %v1663_v9 = vmax.bf16 %v1631_v18, %v1599_v36  ;;  %v1665_v52 = vmax.bf16 %v1633_v57, %v1601_v8  ;;  %v1667_v59 = vmax.bf16 %v1635_v49, %v1603_v1 }
 0x62b   :  { %v3552_v0 = vpack.c.bf16 %v1379_v16, %v1378_v41  ;;  %v1669_v27 = vmax.bf16 %v1637_v53, %v1605_v37  ;;  %v1671_v28 = vmax.bf16 %v1639_v17, %v1607_v58  ;;  %v3555_v54 = vmul.bf16 %v3508_v3, %v1657_v19 }
 0x62c   :  { %v3558_v39 = vmul.bf16 %v3508_v3, %v1659_v40  ;;  %v3561_v47 = vmul.bf16 %v3508_v3, %v1661_v10  ;;  %v3564_v51 = vmul.bf16 %v3508_v3, %v1663_v9  ;;  %v3567_v61 = vmul.bf16 %v3508_v3, %v1665_v52 }
 0x62d   :  { %v1594_v45 = vadd.bf16 %v1409_v50, %v3552_v0  ;;  %v1596_v38 = vadd.bf16 %v1424_v43, %v3552_v0  ;;  %v1598_v15 = vadd.bf16 %v3516_v32, %v3552_v0  ;;  %v1600_v2 = vadd.bf16 %v1448_v24, %v3552_v0 }
 0x62e   :  { %v1602_v14 = vadd.bf16 %v1460_v48, %v3552_v0  ;;  %v1604_v36 = vadd.bf16 %v1472_v4, %v3552_v0  ;;  %v1606_v41 = vadd.bf16 %v1484_v60, %v3552_v0  ;;  %v1608_v8 = vadd.bf16 %v1496_v5, %v3552_v0 }
 0x62f   :  { %v1626_v1 = vmul.bf16 1045249613, %v1594_v45  ;;  %v1628_v37 = vmul.bf16 1045249613, %v1596_v38  ;;  %v1630_v58 = vmul.bf16 1045249613, %v1598_v15  ;;  %v3579_v50 = vmul.bf16 %v3508_v3, %v1667_v59 }
 0x630   :  { %v1632_v43 = vmul.bf16 1045249613, %v1600_v2  ;;  %v1634_v20 = vmul.bf16 1045249613, %v1602_v14  ;;  %v1636_v34 = vmul.bf16 1045249613, %v1604_v36  ;;  %v3582_v32 = vmul.bf16 %v3508_v3, %v1669_v27 }
 0x631   :  { %v1638_v24 = vmul.bf16 1045249613, %v1606_v41  ;;  %v1640_v48 = vmul.bf16 1045249613, %v1608_v8  ;;  %v1658_v63 = vmax.bf16 %v1626_v1, %v1594_v45  ;;  %v1660_v4 = vmax.bf16 %v1628_v37, %v1596_v38 }
 0x632   :  { %v1662_v18 = vmax.bf16 %v1630_v58, %v1598_v15  ;;  %v1664_v60 = vmax.bf16 %v1632_v43, %v1600_v2  ;;  %v1666_v57 = vmax.bf16 %v1634_v20, %v1602_v14  ;;  %v1668_v5 = vmax.bf16 %v1636_v34, %v1604_v36 }
 0x633   :  { %v1670_v49 = vmax.bf16 %v1638_v24, %v1606_v41  ;;  %v1672_v53 = vmax.bf16 %v1640_v48, %v1608_v8  ;;  %v1702_v17 = vmul.bf16 %v3510_v23, %v1658_v63  ;;  %v1704_v19 = vmul.bf16 %v3510_v23, %v1660_v4 }
 0x634   :  { %v1706_v40 = vmul.bf16 %v3510_v23, %v1662_v18  ;;  %v1708_v16 = vmul.bf16 %v3510_v23, %v1664_v60  ;;  %v3589_v10 = vmul.bf16 %v3510_v23, %v1666_v57  ;;  %v3592_v9 = vmul.bf16 %v3510_v23, %v1668_v5 }
 0x635   :  { %v3595_v52 = vmul.bf16 %v3510_v23, %v1670_v49  ;;  %v3598_v59 = vmul.bf16 %v3508_v3, %v1671_v28  ;;  %v3601_v27 = vmul.bf16 %v3510_v23, %v1672_v53  ;;  %v1733_v45 = vunpack.c.l.bf16 %v3555_v54 }
 0x636   :  { %v1734_v38 = vunpack.c.h.bf16 %v3555_v54  ;;  %v1735_v15 = vunpack.c.l.bf16 %v1702_v17  ;;  %v1736_v2 = vunpack.c.h.bf16 %v1702_v17  ;;  %v1737_v14 = vunpack.c.l.bf16 %v3558_v39 }
 0x637   :  { %v1738_v36 = vunpack.c.h.bf16 %v3558_v39  ;;  %v1739_v41 = vunpack.c.l.bf16 %v1704_v19  ;;  %v1740_v8 = vunpack.c.h.bf16 %v1704_v19  ;;  %v1741_v1 = vunpack.c.l.bf16 %v3561_v47 }
 0x638   :  { %v1742_v28 = vunpack.c.h.bf16 %v3561_v47  ;;  %v1743_v37 = vunpack.c.l.bf16 %v1706_v40  ;;  %v1744_v58 = vunpack.c.h.bf16 %v1706_v40  ;;  %v1745_v43 = vunpack.c.l.bf16 %v3564_v51 }
 0x639   :  { %v1746_v20 = vunpack.c.h.bf16 %v3564_v51  ;;  %v1747_v34 = vunpack.c.l.bf16 %v1708_v16  ;;  %v1748_v54 = vunpack.c.h.bf16 %v1708_v16  ;;  %v1749_v24 = vunpack.c.l.bf16 %v3567_v61 }
 0x63a   :  { %v1750_v48 = vunpack.c.h.bf16 %v3567_v61  ;;  %v1751_v39 = vunpack.c.l.bf16 %v3589_v10  ;;  %v1752_v63 = vunpack.c.h.bf16 %v3589_v10  ;;  %v1753_v4 = vunpack.c.l.bf16 %v3579_v50 }
 0x63b   :  { %v1754_v47 = vunpack.c.h.bf16 %v3579_v50  ;;  %v1755_v18 = vunpack.c.l.bf16 %v3592_v9  ;;  %v1756_v60 = vunpack.c.h.bf16 %v3592_v9  ;;  %v1757_v51 = vunpack.c.l.bf16 %v3582_v32 }
 0x63c   :  { %v1758_v57 = vunpack.c.h.bf16 %v3582_v32  ;;  %v1759_v5 = vunpack.c.l.bf16 %v3595_v52  ;;  %v1760_v61 = vunpack.c.h.bf16 %v3595_v52  ;;  %v1761_v49 = vunpack.c.l.bf16 %v3598_v59 }
 0x63d   :  { %v1797_v19 = vsel %vm587_vm1, %v1733_v45, 0.0  ;;  %v1798_v40 = vsel %vm587_vm1, %v1734_v38, 0.0  ;;  %v1800_v16 = vsel %vm587_vm1, %v1735_v15, 0.0  ;;  %v1802_v32 = vsel %vm587_vm1, %v1736_v2, 0.0 }
 0x63e   :  { %v1810_v10 = vsel %vm587_vm1, %v1737_v14, 0.0  ;;  %v1799_v9 = vadd.f32 %v1798_v40, %v1797_v19  ;;  %v1811_v21 = vsel %vm587_vm1, %v1738_v36, 0.0  ;;  %v1813_v42 = vsel %vm587_vm1, %v1739_v41, 0.0 }
 0x63f   :  { %v1815_v30 = vsel %vm587_vm1, %v1740_v8, 0.0  ;;  %v1812_v17 = vadd.f32 %v1811_v21, %v1810_v10  ;;  %v1823_v50 = vsel %vm587_vm1, %v1741_v1, 0.0  ;;  %v1824_v45 = vsel %vm587_vm1, %v1742_v28, 0.0 }
 0x640   :  { %v1826_v38 = vsel %vm587_vm1, %v1743_v37, 0.0  ;;  %v1801_v53 = vadd.f32 %v1800_v16, %v1799_v9  ;;  %v1825_v15 = vadd.f32 %v1824_v45, %v1823_v50  ;;  %v1828_v2 = vsel %vm587_vm1, %v1744_v58, 0.0 }
 0x641   :  { %v1836_v14 = vsel %vm587_vm1, %v1745_v43, 0.0  ;;  %v1814_v19 = vadd.f32 %v1813_v42, %v1812_v17  ;;  %v1837_v36 = vsel %vm587_vm1, %v1746_v20, 0.0  ;;  %v1839_v41 = vsel %vm587_vm1, %v1747_v34, 0.0 }
 0x642   :  { %v1841_v8 = vsel %vm587_vm1, %v1748_v54, 0.0  ;;  %v1803_v21 = vadd.f32 %v1802_v32, %v1801_v53  ;;  %v1827_v40 = vadd.f32 %v1826_v38, %v1825_v15  ;;  %v1838_v1 = vadd.f32 %v1837_v36, %v1836_v14 }
 0x643   :  { %v1849_v28 = vsel %vm587_vm1, %v1749_v24, 0.0  ;;  %v1816_v10 = vadd.f32 %v1815_v30, %v1814_v19  ;;  %v1850_v37 = vsel %vm587_vm1, %v1750_v48, 0.0  ;;  %v1852_v50 = vsel %vm587_vm1, %v1751_v39, 0.0 }
 0x644   :  { %v1854_v58 = vsel %vm587_vm1, %v1752_v63, 0.0  ;;  %v1804_v43 = vrot.slane %v1803_v21, 4  ;;  %v1829_v42 = vadd.f32 %v1828_v2, %v1827_v40  ;;  %v1840_v17 = vadd.f32 %v1839_v41, %v1838_v1 }
 0x645   :  { %v1851_v20 = vadd.f32 %v1850_v37, %v1849_v28  ;;  %v1817_v16 = vrot.slane %v1816_v10, 4  ;;  %v1862_v34 = vsel %vm587_vm1, %v1753_v4, 0.0  ;;  %v1863_v54 = vsel %vm587_vm1, %v1754_v47, 0.0 }
 0x646   :  { %v1865_v53 = vsel %vm587_vm1, %v1755_v18, 0.0  ;;  %v1805_v32 = vadd.f32 %v1804_v43, %v1803_v21  ;;  %v1830_v24 = vrot.slane %v1829_v42, 4  ;;  %v1842_v30 = vadd.f32 %v1841_v8, %v1840_v17 }
 0x647   :  { %v1853_v9 = vadd.f32 %v1852_v50, %v1851_v20  ;;  %v1818_v48 = vadd.f32 %v1817_v16, %v1816_v10  ;;  %v1864_v45 = vadd.f32 %v1863_v54, %v1862_v34  ;;  %v1867_v39 = vsel %vm587_vm1, %v1756_v60, 0.0 }
 0x648   :  { %v1875_v63 = vsel %vm587_vm1, %v1757_v51, 0.0  ;;  %v1806_v38 = vrot.slane %v1805_v32, 2  ;;  %v1831_v15 = vadd.f32 %v1830_v24, %v1829_v42  ;;  %v1843_v2 = vrot.slane %v1842_v30, 4 }
 0x649   :  { %v1855_v14 = vadd.f32 %v1854_v58, %v1853_v9  ;;  %v1819_v19 = vrot.slane %v1818_v48, 2  ;;  %v1866_v4 = vadd.f32 %v1865_v53, %v1864_v45  ;;  %v1876_v47 = vsel %vm587_vm1, %v1758_v57, 0.0 }
 0x64a   :  { %v1878_v18 = vsel %vm587_vm1, %v1759_v5, 0.0  ;;  %v1807_v36 = vadd.f32 %v1806_v38, %v1805_v32  ;;  %v1832_v41 = vrot.slane %v1831_v15, 2  ;;  %v1844_v8 = vadd.f32 %v1843_v2, %v1842_v30 }
 0x64b   :  { %v1856_v21 = vrot.slane %v1855_v14, 4  ;;  %v1820_v40 = vadd.f32 %v1819_v19, %v1818_v48  ;;  %v1868_v1 = vadd.f32 %v1867_v39, %v1866_v4  ;;  %v1877_v28 = vadd.f32 %v1876_v47, %v1875_v63 }
 0x64c   :  { %v1880_v60 = vsel %vm587_vm1, %v1760_v61, 0.0  ;;  %v1808_v51 = vrot.slane %v1807_v36, 1  ;;  %v1833_v10 = vadd.f32 %v1832_v41, %v1831_v15  ;;  %v1845_v37 = vrot.slane %v1844_v8, 2 }
 0x64d   :  { %v1857_v50 = vadd.f32 %v1856_v21, %v1855_v14  ;;  %v1821_v58 = vrot.slane %v1820_v40, 1  ;;  %v1869_v43 = vrot.slane %v1868_v1, 4  ;;  %v1879_v57 = vadd.f32 %v1878_v18, %v1877_v28 }
 0x64e   :  { %v1888_v5 = vsel %vm587_vm1, %v1761_v49, 0.0  ;;  %v1809_v42 = vadd.f32 %v1808_v51, %v1807_v36  ;;  %v1834_v17 = vrot.slane %v1833_v10, 1  ;;  %v1846_v20 = vadd.f32 %v1845_v37, %v1844_v8 }
 0x64f   :  { %v1858_v16 = vrot.slane %v1857_v50, 2  ;;  %v1822_v34 = vadd.f32 %v1821_v58, %v1820_v40  ;;  %v1870_v54 = vadd.f32 %v1869_v43, %v1868_v1  ;;  %v1881_v52 = vadd.f32 %v1880_v60, %v1879_v57 }
 0x650   :  { %v4155_v61 = vunpack.c.h.bf16 %v3598_v59  ;;  %v1835_v32 = vadd.f32 %v1834_v17, %v1833_v10  ;;  %v1847_v24 = vrot.slane %v1846_v20, 1  ;;  %v4156_v39 = vunpack.c.l.bf16 %v3601_v27 }
 0x651   :  { %v1859_v30 = vadd.f32 %v1858_v16, %v1857_v50  ;;  %v1871_v48 = vrot.slane %v1870_v54, 2  ;;  %v1882_v45 = vrot.slane %v1881_v52, 4  ;;  %v3668_v63 = vadd.bf16 %v3514_v22, %v3542_v56 }
 0x652   :  { %v1889_v53 = vsel %vm587_vm1, %v4155_v61, 0.0  ;;  %v1891_v49 = vsel %vm587_vm1, %v4156_v39, 0.0  ;;  %v1848_v38 = vadd.f32 %v1847_v24, %v1846_v20  ;;  %v4157_v59 = vunpack.c.h.bf16 %v3601_v27  ;;  %v1588_v20 = vpop.permute.xlu1 %1587 }
 0x653   :  { %v1890_v9 = vadd.f32 %v1889_v53, %v1888_v5  ;;  %v1860_v15 = vrot.slane %v1859_v30, 1  ;;  %v1872_v19 = vadd.f32 %v1871_v48, %v1870_v54  ;;  %v1883_v4 = vadd.f32 %v1882_v45, %v1881_v52 }
 0x654   :  { %v1893_v14 = vsel %vm587_vm1, %v4157_v59, 0.0  ;;  %v4158_v47 = vrot.slane %v2918_v29, 1  ;;  %v4159_v36 = vrot.slane %v2918_v29, 2  ;;  %v3682_v21 = vadd.f32 %v1809_v42, %v2918_v29 }
 0x655   :  { %v1892_v2 = vadd.f32 %v1891_v49, %v1890_v9  ;;  %v1861_v8 = vadd.f32 %v1860_v15, %v1859_v30  ;;  %v4160_v40 = vrot.slane %v2918_v29, 3  ;;  %v1873_v1 = vrot.slane %v1872_v19, 1 }
 0x656   :  { %v3675_v18 = vadd.f32 %v1822_v34, %v4158_v47  ;;  %v3679_v41 = vadd.f32 %v1835_v32, %v4159_v36  ;;  %v1884_v28 = vrot.slane %v1883_v4, 2  ;;  %v4161_v37 = vrot.slane %v2918_v29, 4 }
 0x657   :  { %v1894_v22 = vadd.f32 %v1893_v14, %v1892_v2  ;;  %v3686_v27 = vadd.f32 %v1848_v38, %v4160_v40  ;;  %v1610_v58 = vadd.bf16 %v3522_v31, %v3552_v0  ;;  %v1611_v43 = vadd.bf16 %v3530_v35, %v3542_v56  ;;  %v1592_v14 = vpop.permute.xlu1 %1591 }
 0x658   :  { %v2037_v60 = vrot.slane %v3675_v18, 7  ;;  %v2039_v51 = vrot.slane %v3679_v41, 6  ;;  %v3692_v50 = vadd.f32 %v1861_v8, %v4161_v37  ;;  %v1874_v57 = vadd.f32 %v1873_v1, %v1872_v19 }
 0x659   :  { %v1895_v10 = vrot.slane %v1894_v22, 4  ;;  %v1885_v5 = vadd.f32 %v1884_v28, %v1883_v4  ;;  %v2041_v17 = vrot.slane %v3686_v27, 5  ;;  %v1612_v52 = vadd.bf16 %v3534_v46, %v3552_v0 }
 0x65a   :  { %v2038_v42 = vsel %vm861_vm2, %v2037_v60, %v3682_v21  ;;  %v2043_v54 = vrot.slane %v3692_v50, 4  ;;  %v4162_v61 = vrot.slane %v2918_v29, 5  ;;  %v1613_v32 = vadd.bf16 %v3512_v62, %v3542_v56 }
 0x65b   :  { %v1896_v16 = vadd.f32 %v1895_v10, %v1894_v22  ;;  %v2040_v34 = vsel %vm864_vm3, %v2039_v51, %v2038_v42  ;;  %v1886_v31 = vrot.slane %v1885_v5, 1  ;;  %v1614_v9 = vadd.bf16 %v3518_v55, %v3552_v0 }
 0x65c   :  { %v3707_v35 = vadd.f32 %v1874_v57, %v4162_v61  ;;  %v2042_v53 = vsel %vm867_vm4, %v2041_v17, %v2040_v34  ;;  %v1615_v48 = vadd.bf16 %v3536_v44, %v3542_v56  ;;  %v1616_v39 = vadd.bf16 %v3532_v7, %v3552_v0 }
 0x65d   :  { %v1897_v24 = vrot.slane %v1896_v16, 2  ;;  %v2044_v30 = vsel %vm870_vm5, %v2043_v54, %v2042_v53  ;;  %v1887_v46 = vadd.f32 %v1886_v31, %v1885_v5  ;;  %v1617_v49 = vadd.bf16 %v3520_v11, %v3542_v56 }
 0x65e   :  { %v2045_v45 = vrot.slane %v3707_v35, 3  ;;  %v1618_v62 = vadd.bf16 %v3526_v25, %v3552_v0  ;;  %v1619_v15 = vadd.bf16 %v3540_v12, %v3542_v56  ;;  %v1620_v55 = vadd.bf16 %v3538_v13, %v3552_v0 }
 0x65f   :  { %v1898_v38 = vadd.f32 %v1897_v24, %v1896_v16  ;;  %v4163_v44 = vrot.slane %v2918_v29, 6  ;;  %v1621_v7 = vadd.bf16 %v3524_v33, %v3542_v56  ;;  %v1622_v11 = vadd.bf16 %v3528_v6, %v3552_v0 }
 0x660   :  { %v2046_v59 = vsel %vm873_vm6, %v2045_v45, %v2044_v30  ;;  %v1623_v19 = vadd.bf16 %v1588_v20, %v3542_v56  ;;  %v1641_v12 = vmul.bf16 1045249613, %v3668_v63  ;;  %v1642_v4 = vmul.bf16 1045249613, %v1610_v58 }
 0x661   :  { %v3730_v2 = vadd.f32 %v1887_v46, %v4163_v44  ;;  %v1899_v25 = vrot.slane %v1898_v38, 1  ;;  %v1624_v47 = vadd.bf16 %v1592_v14, %v3552_v0  ;;  %v1643_v36 = vmul.bf16 1045249613, %v1611_v43 }
 0x662   :  { %v1644_v8 = vmul.bf16 1045249613, %v1612_v52  ;;  %v1645_v40 = vmul.bf16 1045249613, %v1613_v32  ;;  %v1646_v1 = vmul.bf16 1045249613, %v1614_v9  ;;  %v1673_v16 = vmax.bf16 %v1641_v12, %v3668_v63 }
 0x663   :  { %v2047_v13 = vrot.slane %v3730_v2, 2  ;;  %v1900_v22 = vadd.f32 %v1899_v25, %v1898_v38  ;;  %v1647_v33 = vmul.bf16 1045249613, %v1615_v48  ;;  %v1648_v28 = vmul.bf16 1045249613, %v1616_v39 }
 0x664   :  { %v1649_v60 = vmul.bf16 1045249613, %v1617_v49  ;;  %v1650_v6 = vmul.bf16 1045249613, %v1618_v62  ;;  %v4164_v51 = vrot.slane %v2918_v29, 7  ;;  %v1674_v34 = vmax.bf16 %v1642_v4, %v1610_v58 }
 0x665   :  { %v1651_v56 = vmul.bf16 1045249613, %v1619_v15  ;;  %v1652_v37 = vmul.bf16 1045249613, %v1620_v55  ;;  %v1653_v57 = vmul.bf16 1045249613, %v1621_v7  ;;  %v2048_v5 = vsel %vm876_vm7, %v2047_v13, %v2046_v59 }
 0x666   :  { %v3743_v10 = vadd.f32 %v1900_v22, %v4164_v51  ;;  %v1654_v42 = vmul.bf16 1045249613, %v1622_v11  ;;  %v1655_v0 = vmul.bf16 1045249613, %v1623_v19  ;;  %v1656_v17 = vmul.bf16 1045249613, %v1624_v47 }
 0x667   :  { %v1675_v54 = vmax.bf16 %v1643_v36, %v1611_v43  ;;  %v1676_v31 = vmax.bf16 %v1644_v8, %v1612_v52  ;;  %v1677_v61 = vmax.bf16 %v1645_v40, %v1613_v32  ;;  %v1678_v53 = vmax.bf16 %v1646_v1, %v1614_v9 }
 0x668   :  { %v2049_v20 = vrot.slane %v3743_v10, 1  ;;  %v1679_v29 = vmax.bf16 %v1647_v33, %v1615_v48  ;;  %v1680_v30 = vmax.bf16 %v1648_v28, %v1616_v39  ;;  %v1681_v46 = vmax.bf16 %v1649_v60, %v1617_v49 }
 0x669   :  { %v1682_v45 = vmax.bf16 %v1650_v6, %v1618_v62  ;;  %v1683_v44 = vmax.bf16 %v1651_v56, %v1619_v15  ;;  %v1684_v59 = vmax.bf16 %v1652_v37, %v1620_v55  ;;  %v1685_v14 = vmax.bf16 %v1653_v57, %v1621_v7 }
 0x66a   :  { %v2050_v24 = vsel %vm879_vm8, %v2049_v20, %v2048_v5  ;;  %v1686_v25 = vmax.bf16 %v1654_v42, %v1622_v11  ;;  %v1687_v13 = vmax.bf16 %v1655_v0, %v1623_v19  ;;  %v1688_v63 = vmax.bf16 %v1656_v17, %v1624_v47 }
 0x66b   :  { %v2067_v38 = vsel %vm587_vm1, %v2050_v24, -inf  ;;  %v1717_v58 = vmul.bf16 %v3508_v3, %v1673_v16  ;;  %v1718_v43 = vmul.bf16 %v3510_v23, %v1674_v34  ;;  %v1719_v52 = vmul.bf16 %v3508_v3, %v1675_v54 }
 0x66c   :  { %2068 = vmax.xlane.f32.xlu1 %v2067_v38  ;;  %v1720_v32 = vmul.bf16 %v3510_v23, %v1676_v31  ;;  %v1721_v9 = vmul.bf16 %v3508_v3, %v1677_v61  ;;  %v3756_v48 = vmul.bf16 %v3510_v23, %v1678_v53  ;;  %v1723_v39 = vmul.bf16 %v3508_v3, %v1679_v29 }
 0x66d   :  { %v3760_v49 = vmul.bf16 %v3510_v23, %v1680_v30  ;;  %v3763_v62 = vmul.bf16 %v3508_v3, %v1681_v46  ;;  %v3766_v15 = vmul.bf16 %v3510_v23, %v1682_v45  ;;  %v3769_v55 = vmul.bf16 %v3508_v3, %v1683_v44 }
 0x66e   :  { %v3772_v7 = vmul.bf16 %v3510_v23, %v1684_v59  ;;  %v3775_v11 = vmul.bf16 %v3508_v3, %v1685_v14  ;;  %v3778_v19 = vmul.bf16 %v3510_v23, %v1686_v25  ;;  %v3781_v12 = vmul.bf16 %v3508_v3, %v1687_v13 }
 0x66f   :  { %v3784_v4 = vmul.bf16 %v3510_v23, %v1688_v63  ;;  %v1765_v47 = vunpack.c.l.bf16 %v1717_v58  ;;  %v1766_v36 = vunpack.c.h.bf16 %v1717_v58  ;;  %v1767_v8 = vunpack.c.l.bf16 %v1718_v43 }
 0x670   :  { %v1768_v22 = vunpack.c.h.bf16 %v1718_v43  ;;  %v1769_v40 = vunpack.c.l.bf16 %v1719_v52  ;;  %v1770_v1 = vunpack.c.h.bf16 %v1719_v52  ;;  %v1771_v33 = vunpack.c.l.bf16 %v1720_v32 }
 0x671   :  { %v1772_v28 = vunpack.c.h.bf16 %v1720_v32  ;;  %v1773_v60 = vunpack.c.l.bf16 %v1721_v9  ;;  %v1774_v6 = vunpack.c.h.bf16 %v1721_v9  ;;  %v1775_v51 = vunpack.c.l.bf16 %v3756_v48 }
 0x672   :  { %v1776_v56 = vunpack.c.h.bf16 %v3756_v48  ;;  %v1777_v37 = vunpack.c.l.bf16 %v1723_v39  ;;  %v1778_v3 = vunpack.c.h.bf16 %v1723_v39  ;;  %v1779_v57 = vunpack.c.l.bf16 %v3760_v49 }
 0x673   :  { %v1780_v23 = vunpack.c.h.bf16 %v3760_v49  ;;  %v1781_v5 = vunpack.c.l.bf16 %v3763_v62  ;;  %v1782_v42 = vunpack.c.h.bf16 %v3763_v62  ;;  %v1783_v0 = vunpack.c.l.bf16 %v3766_v15 }
 0x674   :  { %v1784_v17 = vunpack.c.h.bf16 %v3766_v15  ;;  %v1785_v20 = vunpack.c.l.bf16 %v3769_v55  ;;  %v1786_v16 = vunpack.c.h.bf16 %v3769_v55  ;;  %v1787_v34 = vunpack.c.l.bf16 %v3772_v7 }
 0x675   :  { %v1788_v54 = vunpack.c.h.bf16 %v3772_v7  ;;  %v1789_v31 = vunpack.c.l.bf16 %v3775_v11  ;;  %v1790_v61 = vunpack.c.h.bf16 %v3775_v11  ;;  %v1791_v53 = vunpack.c.l.bf16 %v3778_v19 }
 0x676   :  { %v1792_v29 = vunpack.c.h.bf16 %v3778_v19  ;;  %v1793_v24 = vunpack.c.l.bf16 %v3781_v12  ;;  %v1794_v30 = vunpack.c.h.bf16 %v3781_v12  ;;  %v1795_v46 = vunpack.c.l.bf16 %v3784_v4 }
 0x677   :  { %v1901_v45 = vsel %vm587_vm1, %v1765_v47, 0.0  ;;  %v1902_v38 = vsel %vm587_vm1, %v1766_v36, 0.0  ;;  %v1796_v44 = vunpack.c.h.bf16 %v3784_v4  ;;  %v1904_v14 = vsel %vm587_vm1, %v1767_v8, 0.0 }
 0x678   :  { %v1903_v59 = vadd.f32 %v1902_v38, %v1901_v45  ;;  %v1914_v25 = vsel %vm587_vm1, %v1769_v40, 0.0  ;;  %v1906_v13 = vsel %vm587_vm1, %v1768_v22, 0.0  ;;  %v1915_v63 = vsel %vm587_vm1, %v1770_v1, 0.0 }
 0x679   :  { %v1917_v58 = vsel %vm587_vm1, %v1771_v33, 0.0  ;;  %v1927_v43 = vsel %vm587_vm1, %v1773_v60, 0.0  ;;  %v1916_v32 = vadd.f32 %v1915_v63, %v1914_v25  ;;  %v1928_v9 = vsel %vm587_vm1, %v1774_v6, 0.0 }
 0x67a   :  { %v1905_v52 = vadd.f32 %v1904_v14, %v1903_v59  ;;  %v1930_v48 = vsel %vm587_vm1, %v1775_v51, 0.0  ;;  %v1919_v39 = vsel %vm587_vm1, %v1772_v28, 0.0  ;;  %v1929_v49 = vadd.f32 %v1928_v9, %v1927_v43 }
 0x67b   :  { %v1940_v62 = vsel %vm587_vm1, %v1777_v37, 0.0  ;;  %v1941_v15 = vsel %vm587_vm1, %v1778_v3, 0.0  ;;  %v1918_v11 = vadd.f32 %v1917_v58, %v1916_v32  ;;  %v1943_v36 = vsel %vm587_vm1, %v1779_v57, 0.0 }
 0x67c   :  { %v1907_v55 = vadd.f32 %v1906_v13, %v1905_v52  ;;  %v1942_v47 = vadd.f32 %v1941_v15, %v1940_v62  ;;  %v1931_v8 = vadd.f32 %v1930_v48, %v1929_v49  ;;  %v1932_v22 = vsel %vm587_vm1, %v1776_v56, 0.0 }
 0x67d   :  { %v1953_v40 = vsel %vm587_vm1, %v1781_v5, 0.0  ;;  %v1954_v1 = vsel %vm587_vm1, %v1782_v42, 0.0  ;;  %v1920_v60 = vadd.f32 %v1919_v39, %v1918_v11  ;;  %v1945_v37 = vsel %vm587_vm1, %v1780_v23, 0.0 }
 0x67e   :  { %v1908_v33 = vrot.slane %v1907_v55, 4  ;;  %v1944_v28 = vadd.f32 %v1943_v36, %v1942_v47  ;;  %v1955_v6 = vadd.f32 %v1954_v1, %v1953_v40  ;;  %v1933_v51 = vadd.f32 %v1932_v22, %v1931_v8 }
 0x67f   :  { %v1956_v3 = vsel %vm587_vm1, %v1783_v0, 0.0  ;;  %v1966_v45 = vsel %vm587_vm1, %v1785_v20, 0.0  ;;  %v1921_v57 = vrot.slane %v1920_v60, 4  ;;  %v1958_v5 = vsel %vm587_vm1, %v1784_v17, 0.0 }
 0x680   :  { %v1909_v38 = vadd.f32 %v1908_v33, %v1907_v55  ;;  %v1946_v59 = vadd.f32 %v1945_v37, %v1944_v28  ;;  %v1957_v14 = vadd.f32 %v1956_v3, %v1955_v6  ;;  %v1934_v56 = vrot.slane %v1933_v51, 4 }
 0x681   :  { %v1967_v42 = vsel %vm587_vm1, %v1786_v16, 0.0  ;;  %v1969_v25 = vsel %vm587_vm1, %v1787_v34, 0.0  ;;  %v1922_v63 = vadd.f32 %v1921_v57, %v1920_v60  ;;  %v1979_v0 = vsel %vm587_vm1, %v1789_v31, 0.0 }
 0x682   :  { %v1910_v13 = vrot.slane %v1909_v38, 2  ;;  %v1947_v58 = vrot.slane %v1946_v59, 4  ;;  %v1959_v43 = vadd.f32 %v1958_v5, %v1957_v14  ;;  %v1935_v23 = vadd.f32 %v1934_v56, %v1933_v51 }
 0x683   :  { %v1968_v52 = vadd.f32 %v1967_v42, %v1966_v45  ;;  %v1980_v20 = vsel %vm587_vm1, %v1790_v61, 0.0  ;;  %v1923_v9 = vrot.slane %v1922_v63, 2  ;;  %v1982_v16 = vsel %vm587_vm1, %v1791_v53, 0.0 }
 0x684   :  { %v1911_v32 = vadd.f32 %v1910_v13, %v1909_v38  ;;  %v1948_v48 = vadd.f32 %v1947_v58, %v1946_v59  ;;  %v1960_v39 = vrot.slane %v1959_v43, 4  ;;  %v1936_v49 = vrot.slane %v1935_v23, 2 }
 0x685   :  { %v1970_v17 = vadd.f32 %v1969_v25, %v1968_v52  ;;  %v1981_v62 = vadd.f32 %v1980_v20, %v1979_v0  ;;  %v1924_v34 = vadd.f32 %v1923_v9, %v1922_v63  ;;  %v1971_v11 = vsel %vm587_vm1, %v1788_v54, 0.0 }
 0x686   :  { %v1949_v15 = vrot.slane %v1948_v48, 2  ;;  %v1961_v55 = vadd.f32 %v1960_v39, %v1959_v43  ;;  %v1912_v47 = vrot.slane %v1911_v32, 1  ;;  %v1937_v31 = vadd.f32 %v1936_v49, %v1935_v23 }
 0x687   :  { %v1972_v36 = vadd.f32 %v1971_v11, %v1970_v17  ;;  %v1983_v61 = vadd.f32 %v1982_v16, %v1981_v62  ;;  %v1925_v8 = vrot.slane %v1924_v34, 1  ;;  %v1984_v1 = vsel %vm587_vm1, %v1792_v29, 0.0 }
 0x688   :  { %v1950_v22 = vadd.f32 %v1949_v15, %v1948_v48  ;;  %v1962_v40 = vrot.slane %v1961_v55, 2  ;;  %v1938_v33 = vrot.slane %v1937_v31, 1  ;;  %v1992_v7 = vsel %vm587_vm1, %v1793_v24, 0.0 }
 0x689   :  { %v1973_v53 = vrot.slane %v1972_v36, 4  ;;  %v1985_v60 = vadd.f32 %v1984_v1, %v1983_v61  ;;  %v1926_v28 = vadd.f32 %v1925_v8, %v1924_v34  ;;  %v1993_v51 = vsel %vm587_vm1, %v1794_v30, 0.0 }
 0x68a   :  { %v1951_v54 = vrot.slane %v1950_v22, 1  ;;  %v1963_v6 = vadd.f32 %v1962_v40, %v1961_v55  ;;  %v1939_v37 = vadd.f32 %v1938_v33, %v1937_v31  ;;  %v1994_v19 = vadd.f32 %v1993_v51, %v1992_v7 }
 0x68b   :  { %v1974_v3 = vadd.f32 %v1973_v53, %v1972_v36  ;;  %v1986_v45 = vrot.slane %v1985_v60, 4  ;;  %v1913_v38 = vadd.f32 %v1912_v47, %v1911_v32  ;;  %v1995_v59 = vsel %vm587_vm1, %v1795_v46, 0.0 }
 0x68c   :  { %v1952_v29 = vadd.f32 %v1951_v54, %v1950_v22  ;;  %v1964_v57 = vrot.slane %v1963_v6, 1  ;;  %v1996_v56 = vadd.f32 %v1995_v59, %v1994_v19  ;;  %v1997_v12 = vsel %vm587_vm1, %v1796_v44, 0.0 }
 0x68d   :  { %v1975_v14 = vrot.slane %v1974_v3, 2  ;;  %v1987_v24 = vadd.f32 %v1986_v45, %v1985_v60  ;;  %v4165_v30 = vrot.slane %v2914_v26, 1  ;;  %v4166_v25 = vrot.slane %v2914_v26, 2 }
 0x68e   :  { %v1965_v5 = vadd.f32 %v1964_v57, %v1963_v6  ;;  %v4167_v63 = vrot.slane %v2914_v26, 3  ;;  %v1998_v23 = vadd.f32 %v1997_v12, %v1996_v56  ;;  %v3863_v4 = vadd.f32 %v1913_v38, %v2914_v26 }
 0x68f   :  { %v3852_v42 = vadd.f32 %v1926_v28, %v4165_v30  ;;  %v3856_v13 = vadd.f32 %v1939_v37, %v4166_v25  ;;  %v1976_v46 = vadd.f32 %v1975_v14, %v1974_v3  ;;  %v1988_v43 = vrot.slane %v1987_v24, 2 }
 0x690   :  { %v3860_v58 = vadd.f32 %v1952_v29, %v4167_v63  ;;  %v1999_v32 = vrot.slane %v1998_v23, 4  ;;  %v4168_v9 = vrot.slane %v2914_v26, 4  ;;  %v4169_v11 = vrot.slane %v2914_v26, 5 }
 0x691   :  { %v2051_v44 = vrot.slane %v3852_v42, 7  ;;  %v2053_v52 = vrot.slane %v3856_v13, 6  ;;  %v1977_v0 = vrot.slane %v1976_v46, 1  ;;  %v1989_v20 = vadd.f32 %v1988_v43, %v1987_v24 }
 0x692   :  { %v3869_v48 = vadd.f32 %v1965_v5, %v4168_v9  ;;  %v2055_v49 = vrot.slane %v3860_v58, 5  ;;  %v2000_v16 = vadd.f32 %v1999_v32, %v1998_v23  ;;  %v4170_v8 = vrot.slane %v2914_v26, 6 }
 0x693   :  { %v2052_v39 = vsel %vm861_vm2, %v2051_v44, %v3863_v4  ;;  %v1978_v17 = vadd.f32 %v1977_v0, %v1976_v46  ;;  %v1990_v62 = vrot.slane %v1989_v20, 1  ;;  %v4171_v28 = vrot.slane %v2914_v26, 7 }
 0x694   :  { %v2054_v34 = vsel %vm864_vm3, %v2053_v52, %v2052_v39  ;;  %v2001_v55 = vrot.slane %v2000_v16, 2  ;;  %v2057_v36 = vrot.slane %v3869_v48, 4 }
 0x695   :  { %v1991_v15 = vadd.f32 %v1990_v62, %v1989_v20  ;;  %v3877_v47 = vadd.f32 %v1978_v17, %v4169_v11  ;;  %v2056_v31 = vsel %vm867_vm4, %v2055_v49, %v2054_v34 }
 0x696   :  { %v2002_v61 = vadd.f32 %v2001_v55, %v2000_v16  ;;  %v2058_v40 = vsel %vm870_vm5, %v2057_v36, %v2056_v31 }
 0x697   :  { %v3883_v22 = vadd.f32 %v1991_v15, %v4170_v8  ;;  %v2059_v33 = vrot.slane %v3877_v47, 3 }
 0x698   :  { %v2003_v1 = vrot.slane %v2002_v61, 1 }
 0x699   :  { %v2060_v60 = vsel %vm873_vm6, %v2059_v33, %v2058_v40  ;;  %v2061_v7 = vrot.slane %v3883_v22, 2 }
 0x69a   :  { %v2004_v53 = vadd.f32 %v2003_v1, %v2002_v61 }
 0x69b   :  { %v2062_v6 = vsel %vm876_vm7, %v2061_v7, %v2060_v60 }
 0x69c   :  { %v3891_v54 = vadd.f32 %v2004_v53, %v4171_v28 }
 0x69e   :  { %v2063_v51 = vrot.slane %v3891_v54, 1 }
 0x6a0   :  { %v2064_v37 = vsel %vm879_vm8, %v2063_v51, %v2062_v6 }
 0x6a1   :  { %v2070_v3 = vsel %vm587_vm1, %v2064_v37, -inf }
 0x6a2   :  { %2071 = vmax.xlane.f32.xlu0 %v2070_v3 }
 0x6f9   :  { %v2069_v45 = vpop.xlane.xlu1 %2068 }
 0x6fa   :  { %v2075_v19 = vrot.slane %v2069_v45, 1  ;;  %v2076_v38 = vrot.slane %v2069_v45, 2  ;;  %v2077_v29 = vrot.slane %v2069_v45, 3  ;;  %v2078_v57 = vrot.slane %v2069_v45, 4 }
 0x6fb   :  { %v2105_v59 = vsub.f32 %v3682_v21, %v2069_v45  ;;  %v2079_v14 = vrot.slane %v2069_v45, 5  ;;  %v2080_v26 = vrot.slane %v2069_v45, 6  ;;  %v2081_v24 = vrot.slane %v2069_v45, 7 }
 0x6fc   :  { %v2106_v56 = vsub.f32 %v3675_v18, %v2075_v19  ;;  %v2107_v12 = vsub.f32 %v3679_v41, %v2076_v38  ;;  %v2108_v5 = vsub.f32 %v3686_v27, %v2077_v29  ;;  %v2109_v30 = vsub.f32 %v3692_v50, %v2078_v57 }
 0x6fd   :  { %v2121_v25 = vpack.c.bf16 %v2105_v59, %v2105_v59  ;;  %v2110_v63 = vsub.f32 %v3707_v35, %v2079_v14  ;;  %v2111_v46 = vsub.f32 %v3730_v2, %v2080_v26  ;;  %v2112_v43 = vsub.f32 %v3743_v10, %v2081_v24 }
 0x6fe   :  { %v2122_v23 = vpack.c.bf16 %v2106_v56, %v2106_v56  ;;  %v2123_v21 = vpack.c.bf16 %v2107_v12, %v2107_v12  ;;  %v2124_v44 = vpack.c.bf16 %v2108_v5, %v2108_v5  ;;  %v2125_v52 = vpack.c.bf16 %v2109_v30, %v2109_v30 }
 0x6ff   :  { %v2138_v0 = vmul.bf16 1069105081, %v2121_v25  ;;  %v2126_v20 = vpack.c.bf16 %v2110_v63, %v2110_v63  ;;  %v2127_v18 = vpack.c.bf16 %v2111_v46, %v2111_v46  ;;  %v2128_v41 = vpack.c.bf16 %v2112_v43, %v2112_v43 }
 0x700   :  { %v2141_v32 = vmul.bf16 1069105081, %v2122_v23  ;;  %v2144_v9 = vmul.bf16 1069105081, %v2123_v21  ;;  %v2147_v27 = vmul.bf16 1069105081, %v2124_v44 }
 0x701   :  { %2687 = vpow.bf16 %v2138_v0  ;;  %v2150_v50 = vmul.bf16 1069105081, %v2125_v52  ;;  %v2153_v39 = vmul.bf16 1069105081, %v2126_v20  ;;  %v2156_v35 = vmul.bf16 1069105081, %v2127_v18 }
 0x702   :  { %2689 = vpow.bf16 %v2141_v32  ;;  %v2159_v2 = vmul.bf16 1069105081, %v2128_v41 }
 0x703   :  { %2691 = vpow.bf16 %v2144_v9 }
 0x704   :  { %2693 = vpow.bf16 %v2147_v27 }
 0x705   :  { %2695 = vpow.bf16 %v2150_v50 }
 0x706   :  { %2697 = vpow.bf16 %v2153_v39 }
 0x707   :  { %2699 = vpow.bf16 %v2156_v35 }
 0x708   :  { %2701 = vpow.bf16 %v2159_v2 }
 0x70c   :  { %v3905_v10 = vpop.eup %2687 }
 0x70d   :  { %v3907_v49 = vpop.eup %2689  ;;  %v2185_v55 = vunpack.c.l.bf16 %v3905_v10 }
 0x70e   :  { %v3909_v17 = vpop.eup %2691  ;;  %v2186_v62 = vunpack.c.l.bf16 %v3907_v49 }
 0x70f   :  { %v3912_v16 = vpop.eup %2693  ;;  %v2187_v34 = vunpack.c.l.bf16 %v3909_v17 }
 0x710   :  { %v3915_v15 = vpop.eup %2695  ;;  %v2188_v11 = vunpack.c.l.bf16 %v3912_v16  ;;  %v2217_v31 = vrot.slane %v2186_v62, 7 }
 0x711   :  { %v3921_v36 = vpop.eup %2697  ;;  %v2189_v61 = vunpack.c.l.bf16 %v3915_v15  ;;  %v2219_v8 = vrot.slane %v2187_v34, 6 }
 0x712   :  { %v3926_v40 = vpop.eup %2699  ;;  %v2190_v1 = vunpack.c.l.bf16 %v3921_v36  ;;  %v2218_v33 = vsel %vm861_vm2, %v2217_v31, %v2185_v55  ;;  %v2221_v53 = vrot.slane %v2188_v11, 5 }
 0x713   :  { %v3934_v60 = vpop.eup %2701  ;;  %v2191_v7 = vunpack.c.l.bf16 %v3926_v40  ;;  %v2220_v28 = vsel %vm864_vm3, %v2219_v8, %v2218_v33  ;;  %v2223_v6 = vrot.slane %v2189_v61, 4 }
 0x714   :  { %v2192_v51 = vunpack.c.l.bf16 %v3934_v60  ;;  %v2222_v37 = vsel %vm867_vm4, %v2221_v53, %v2220_v28  ;;  %v2225_v3 = vrot.slane %v2190_v1, 3 }
 0x715   :  { %v2224_v45 = vsel %vm870_vm5, %v2223_v6, %v2222_v37  ;;  %v2227_v19 = vrot.slane %v2191_v7, 2 }
 0x716   :  { %v2226_v38 = vsel %vm873_vm6, %v2225_v3, %v2224_v45  ;;  %v2229_v29 = vrot.slane %v2192_v51, 1 }
 0x717   :  { %v2228_v57 = vsel %vm876_vm7, %v2227_v19, %v2226_v38 }
 0x718   :  { %v2230_v59 = vsel %vm879_vm8, %v2229_v29, %v2228_v57 }
 0x719   :  { %v2247_v14 = vsel %vm587_vm1, %v2230_v59, 0.0 }
 0x71a   :  { %2248 = vadd.xlane.f32.xlu1 %v2247_v14 }
 0x72f   :  { %v2072_v26 = vpop.xlane.xlu0 %2071 }
 0x730   :  { %v2082_v24 = vrot.slane %v2072_v26, 1  ;;  %v2083_v56 = vrot.slane %v2072_v26, 2  ;;  %v2084_v12 = vrot.slane %v2072_v26, 3  ;;  %v2085_v5 = vrot.slane %v2072_v26, 4 }
 0x731   :  { %v2086_v30 = vrot.slane %v2072_v26, 5  ;;  %v2087_v25 = vrot.slane %v2072_v26, 6  ;;  %v2113_v63 = vsub.f32 %v3863_v4, %v2072_v26  ;;  %v2088_v46 = vrot.slane %v2072_v26, 7 }
 0x732   :  { %v2114_v43 = vsub.f32 %v3852_v42, %v2082_v24  ;;  %v2115_v23 = vsub.f32 %v3856_v13, %v2083_v56  ;;  %v2116_v21 = vsub.f32 %v3860_v58, %v2084_v12  ;;  %v2117_v44 = vsub.f32 %v3869_v48, %v2085_v5 }
 0x733   :  { %v2129_v52 = vpack.c.bf16 %v2113_v63, %v2113_v63  ;;  %v2118_v0 = vsub.f32 %v3877_v47, %v2086_v30  ;;  %v2119_v20 = vsub.f32 %v3883_v22, %v2087_v25  ;;  %v2120_v18 = vsub.f32 %v3891_v54, %v2088_v46 }
 0x734   :  { %v2130_v32 = vpack.c.bf16 %v2114_v43, %v2114_v43  ;;  %v2131_v41 = vpack.c.bf16 %v2115_v23, %v2115_v23  ;;  %v2132_v9 = vpack.c.bf16 %v2116_v21, %v2116_v21  ;;  %v2133_v4 = vpack.c.bf16 %v2117_v44, %v2117_v44 }
 0x735   :  { %v2162_v27 = vmul.bf16 1069105081, %v2129_v52  ;;  %v2134_v50 = vpack.c.bf16 %v2118_v0, %v2118_v0  ;;  %v2135_v42 = vpack.c.bf16 %v2119_v20, %v2119_v20  ;;  %v2136_v58 = vpack.c.bf16 %v2120_v18, %v2120_v18  ;;  %v2432_v20 = vld [vmem:[%s4097_s10] sm:$0xff]  ;;  %v2433_v18 = vld [vmem:[%s4097_s10 + $0x8] sm:$0xff] }
 0x736   :  { %v2165_v39 = vmul.bf16 1069105081, %v2130_v32  ;;  %v2168_v13 = vmul.bf16 1069105081, %v2131_v41  ;;  %v2171_v35 = vmul.bf16 1069105081, %v2132_v9  ;;  %v2638_v32 = vpack.c.bf16 %v2433_v18, %v2432_v20 }
 0x737   :  { %2703 = vpow.bf16 %v2162_v27  ;;  %v2174_v48 = vmul.bf16 1069105081, %v2133_v4  ;;  %v2177_v2 = vmul.bf16 1069105081, %v2134_v50  ;;  %v2180_v47 = vmul.bf16 1069105081, %v2135_v42 }
 0x738   :  { %2705 = vpow.bf16 %v2165_v39  ;;  %v2183_v22 = vmul.bf16 1069105081, %v2136_v58  ;;  %2639 = vmatprep.subr.bf16.mxu0 %v2638_v32 }
 0x739   :  { %2707 = vpow.bf16 %v2168_v13  ;;  %2641 = vmatpush3.bf16.msra.mxu0 %v2638_v32 }
 0x73a   :  { %2709 = vpow.bf16 %v2171_v35 }
 0x73b   :  { %2711 = vpow.bf16 %v2174_v48 }
 0x73c   :  { %2713 = vpow.bf16 %v2177_v2 }
 0x73d   :  { %2715 = vpow.bf16 %v2180_v47 }
 0x73e   :  { %2717 = vpow.bf16 %v2183_v22 }
 0x742   :  { %v3961_v54 = vpop.eup %2703 }
 0x743   :  { %v3963_v31 = vpop.eup %2705  ;;  %v2193_v37 = vunpack.c.l.bf16 %v3961_v54 }
 0x744   :  { %v3965_v8 = vpop.eup %2707  ;;  %v2194_v33 = vunpack.c.l.bf16 %v3963_v31 }
 0x745   :  { %v3968_v53 = vpop.eup %2709  ;;  %v2195_v28 = vunpack.c.l.bf16 %v3965_v8 }
 0x746   :  { %v3971_v6 = vpop.eup %2711  ;;  %v2196_v3 = vunpack.c.l.bf16 %v3968_v53  ;;  %v2231_v45 = vrot.slane %v2194_v33, 7 }
 0x747   :  { %v3977_v19 = vpop.eup %2713  ;;  %v2197_v38 = vunpack.c.l.bf16 %v3971_v6  ;;  %v2233_v29 = vrot.slane %v2195_v28, 6 }
 0x748   :  { %v3982_v57 = vpop.eup %2715  ;;  %v2198_v59 = vunpack.c.l.bf16 %v3977_v19  ;;  %v2232_v14 = vsel %vm861_vm2, %v2231_v45, %v2193_v37  ;;  %v2235_v26 = vrot.slane %v2196_v3, 5 }
 0x749   :  { %v3990_v24 = vpop.eup %2717  ;;  %v2199_v56 = vunpack.c.l.bf16 %v3982_v57  ;;  %v2234_v12 = vsel %vm864_vm3, %v2233_v29, %v2232_v14  ;;  %v2237_v5 = vrot.slane %v2197_v38, 4 }
 0x74a   :  { %v2200_v30 = vunpack.c.l.bf16 %v3990_v24  ;;  %v2236_v25 = vsel %vm867_vm4, %v2235_v26, %v2234_v12  ;;  %v2239_v63 = vrot.slane %v2198_v59, 3 }
 0x74b   :  { %v2238_v46 = vsel %vm870_vm5, %v2237_v5, %v2236_v25  ;;  %v2241_v43 = vrot.slane %v2199_v56, 2 }
 0x74c   :  { %v2240_v23 = vsel %vm873_vm6, %v2239_v63, %v2238_v46  ;;  %v2243_v21 = vrot.slane %v2200_v30, 1 }
 0x74d   :  { %v2242_v44 = vsel %vm876_vm7, %v2241_v43, %v2240_v23 }
 0x74e   :  { %v2244_v52 = vsel %vm879_vm8, %v2243_v21, %v2242_v44 }
 0x74f   :  { %v2250_v0 = vsel %vm587_vm1, %v2244_v52, 0.0 }
 0x750   :  { %2251 = vadd.xlane.f32.xlu1 %v2250_v0 }
 0x7a7   :  { %v2249_v41 = vpop.xlane.xlu1 %2248 }
 0x7a8   :  { %2719 = vrcp.f32 %v2249_v41 }
 0x7b2   :  { %v2720_v9 = vpop.eup %2719 }
 0x7b3   :  { %v2257_v4 = vrot.slane %v2720_v9, 1  ;;  %v2258_v27 = vrot.slane %v2720_v9, 2  ;;  %v2259_v39 = vrot.slane %v2720_v9, 3  ;;  %v2287_v35 = vmul.f32 %v2720_v9, %v2185_v55 }
 0x7b4   :  { %v2260_v47 = vrot.slane %v2720_v9, 4  ;;  %v2261_v22 = vrot.slane %v2720_v9, 5  ;;  %v2262_v17 = vrot.slane %v2720_v9, 6  ;;  %v2263_v12 = vrot.slane %v2720_v9, 7 }
 0x7b5   :  { %v2288_v50 = vmul.f32 %v2257_v4, %v2186_v62  ;;  %v2289_v42 = vmul.f32 %v2258_v27, %v2187_v34  ;;  %v2290_v48 = vmul.f32 %v2259_v39, %v2188_v11  ;;  %v2303_v45 = vpack.c.bf16 %v2287_v35, %v2287_v35 }
 0x7b6   :  { %v2291_v34 = vmul.f32 %v2260_v47, %v2189_v61  ;;  %v2292_v10 = vmul.f32 %v2261_v22, %v2190_v1  ;;  %v2293_v5 = vmul.f32 %v2262_v17, %v2191_v7  ;;  %v2294_v15 = vmul.f32 %v2263_v12, %v2192_v51 }
 0x7b7   :  { %v2304_v13 = vpack.c.bf16 %v2288_v50, %v2288_v50  ;;  %v2305_v58 = vpack.c.bf16 %v2289_v42, %v2289_v42  ;;  %v2306_v49 = vpack.c.bf16 %v2290_v48, %v2290_v48  ;;  %v2341_v55 = vunpack.c.l.b16 %v2303_v45 }
 0x7b8   :  { %v2307_v25 = vpack.c.bf16 %v2291_v34, %v2291_v34  ;;  %v2308_v63 = vpack.c.bf16 %v2292_v10, %v2292_v10  ;;  %v2309_v36 = vpack.c.bf16 %v2293_v5, %v2293_v5  ;;  %v2310_v50 = vpack.c.bf16 %v2294_v15, %v2294_v15  ;;  %v2435_v15 = vld [vmem:[%s4097_s10 + $0x18] sm:$0xff] }
 0x7b9   :  { %v2342_v2 = vunpack.c.l.b16 %v2304_v13  ;;  %v2343_v14 = vunpack.c.l.b16 %v2305_v58  ;;  %v2344_v16 = vunpack.c.l.b16 %v2306_v49 }
 0x7ba   :  { %v2345_v1 = vunpack.c.l.b16 %v2307_v25  ;;  %v2346_v23 = vunpack.c.l.b16 %v2308_v63  ;;  %v2348_v48 = vunpack.c.l.b16 %v2310_v50 }
 0x7bb   :  { %v2357_v62 = vrot.slane %v2342_v2, 7  ;;  %v2359_v26 = vrot.slane %v2343_v14, 6  ;;  %v2361_v43 = vrot.slane %v2344_v16, 5 }
 0x7bc   :  { %v2363_v42 = vrot.slane %v2345_v1, 4  ;;  %v2369_v16 = vrot.slane %v2348_v48, 1 }
 0x7bd   :  { %v2358_v11 = vsel %vm861_vm2, %v2357_v62, %v2341_v55 }
 0x7be   :  { %v2360_v46 = vsel %vm864_vm3, %v2359_v26, %v2358_v11 }
 0x7bf   :  { %v2362_v21 = vsel %vm867_vm4, %v2361_v43, %v2360_v46  ;;  %v2434_v43 = vld [vmem:[%s4097_s10 + $0x10] sm:$0xff] }
 0x7c0   :  { %v2364_v57 = vsel %vm870_vm5, %v2363_v42, %v2362_v21 }
 0x7dd   :  { %v2252_v29 = vpop.xlane.xlu1 %2251 }
 0x7de   :  { %2721 = vrcp.f32 %v2252_v29 }
 0x7e8   :  { %v2722_v61 = vpop.eup %2721 }
 0x7e9   :  { %v2264_v44 = vrot.slane %v2722_v61, 1  ;;  %v2265_v52 = vrot.slane %v2722_v61, 2  ;;  %v2266_v0 = vrot.slane %v2722_v61, 3  ;;  %v2267_v20 = vrot.slane %v2722_v61, 4 }
 0x7ea   :  { %v2268_v40 = vrot.slane %v2722_v61, 5  ;;  %v2269_v7 = vrot.slane %v2722_v61, 6  ;;  %v2270_v18 = vrot.slane %v2722_v61, 7  ;;  %v2295_v32 = vmul.f32 %v2722_v61, %v2193_v37 }
 0x7eb   :  { %v2296_v60 = vmul.f32 %v2264_v44, %v2194_v33  ;;  %v2297_v51 = vmul.f32 %v2265_v52, %v2195_v28  ;;  %v2298_v41 = vmul.f32 %v2266_v0, %v2196_v3  ;;  %v2299_v9 = vmul.f32 %v2267_v20, %v2197_v38 }
 0x7ec   :  { %v2300_v4 = vmul.f32 %v2268_v40, %v2198_v59  ;;  %v2301_v27 = vmul.f32 %v2269_v7, %v2199_v56  ;;  %v2302_v54 = vmul.f32 %v2270_v18, %v2200_v30  ;;  %v2311_v31 = vpack.c.bf16 %v2295_v32, %v2295_v32  ;;  %v2565_v7 = vld [vmem:[%s4099_s11] ss:$0 sm:$0xff] }
 0x7ed   :  { %v2312_v33 = vpack.c.bf16 %v2296_v60, %v2296_v60  ;;  %v2313_v37 = vpack.c.bf16 %v2297_v51, %v2297_v51  ;;  %v2314_v8 = vpack.c.bf16 %v2298_v41, %v2298_v41  ;;  %v2315_v28 = vpack.c.bf16 %v2299_v9, %v2299_v9 }
 0x7ee   :  { %v2316_v53 = vpack.c.bf16 %v2300_v4, %v2300_v4  ;;  %v2317_v3 = vpack.c.bf16 %v2301_v27, %v2301_v27  ;;  %v2318_v6 = vpack.c.bf16 %v2302_v54, %v2302_v54  ;;  %v2347_v59 = vunpack.c.l.b16 %v2309_v36  ;;  %v2563_v36 = vld [vmem:[%s4098_s9] ss:$0 sm:$0xff] }
 0x7ef   :  { %v2350_v38 = vunpack.c.l.b16 %v2312_v33  ;;  %v2351_v39 = vunpack.c.l.b16 %v2313_v37  ;;  %v2352_v19 = vunpack.c.l.b16 %v2314_v8  ;;  %v2353_v13 = vunpack.c.l.b16 %v2315_v28 }
 0x7f0   :  { %v2365_v56 = vrot.slane %v2346_v23, 3  ;;  %v2349_v24 = vunpack.c.l.b16 %v2311_v31  ;;  %v2354_v30 = vunpack.c.l.b16 %v2316_v53  ;;  %v2355_v2 = vunpack.c.l.b16 %v2317_v3 }
 0x7f1   :  { %v2371_v35 = vrot.slane %v2350_v38, 7  ;;  %v2373_v58 = vrot.slane %v2351_v39, 6  ;;  %v2356_v47 = vunpack.c.l.b16 %v2318_v6  ;;  %v2375_v29 = vrot.slane %v2352_v19, 5 }
 0x7f2   :  { %v2366_v22 = vsel %vm873_vm6, %v2365_v56, %v2364_v57  ;;  %v2367_v14 = vrot.slane %v2347_v59, 2  ;;  %v2377_v62 = vrot.slane %v2353_v13, 4  ;;  %v2379_v34 = vrot.slane %v2354_v30, 3 }
 0x7f3   :  { %v2372_v45 = vsel %vm861_vm2, %v2371_v35, %v2349_v24  ;;  %v2381_v26 = vrot.slane %v2355_v2, 2  ;;  %v2383_v12 = vrot.slane %v2356_v47, 1  ;;  %v2642_v61 = vpack.c.bf16 %v2435_v15, %v2434_v43 }
 0x7f4   :  { %v2374_v49 = vsel %vm864_vm3, %v2373_v58, %v2372_v45  ;;  %v2368_v10 = vsel %vm876_vm7, %v2367_v14, %v2366_v22 }
 0x7f5   :  { %v2376_v17 = vsel %vm867_vm4, %v2375_v29, %v2374_v49  ;;  %v2370_v25 = vsel %vm879_vm8, %v2369_v16, %v2368_v10  ;;  %2643 = vmatprep.subr.bf16.mxu0 %v2642_v61 }
 0x7f6   :  { %v2378_v55 = vsel %vm870_vm5, %v2377_v62, %v2376_v17  ;;  %2645 = vmatpush3.bf16.msra.mxu0 %v2642_v61 }
 0x7f7   :  { %v2380_v11 = vsel %vm873_vm6, %v2379_v34, %v2378_v55 }
 0x7f8   :  { %v2382_v5 = vsel %vm876_vm7, %v2381_v26, %v2380_v11 }
 0x7f9   :  { %v2384_v63 = vsel %vm879_vm8, %v2383_v12, %v2382_v5 }
 0x7fa   :  { %v2385_v46 = vpack.c.b16 %v2384_v63, %v2370_v25 }
 0x7fc   :  { %2616 = vmatmul.mubr.msk.bf16.vlgmr.msra.gmra.mrb[4].mxu1 %vm587_vm1, %v2385_v46 }
 0x8cf   :  { %v2423_v1 = vpop.f32.mrb[4].mxu1 }
 0x8d0   :  { %v2424_v23 = vadd.f32 %v2563_v36, %v2423_v1  ;;  %v2617_v21 = vpop.f32.mrb[5].mxu1 }
 0x8d1   :  { %v2426_v44 = vpop.f32.mrb[6].mxu1 }
 0x8d2   :  { %v2430_v52 = vmax.f32 %v2424_v23, 0.0  ;;  %v2427_v0 = vadd.f32 %v2563_v36, %v2426_v44  ;;  %v2618_v20 = vpop.f32.mrb[7].mxu1 }
 0x8d4   :  { %v2431_v40 = vmax.f32 %v2427_v0, 0.0  ;;  %2627 = vmatprep.mubr.msk.f32.mxu0 %vm1278_vm10, %v2430_v52 }
 0x8d6   :  { %2628 = vmatmul.mubr.msk.f32.vlgmr.msra.gmra.mrb[4].mxu0 %vm1278_vm10, %v2431_v40 }
 0x9a9   :  { %v2629_v18 = vpop.f32.mrb[4].mxu0 }
 0x9aa   :  { %v2515_v32 = vpop.f32.mrb[5].mxu0  ;;  %v2521_v51 = vadd.f32 %v2629_v18, %v2565_v7 }
 0x9ab   :  { %v2516_v60 = vadd.f32 %v2565_v7, %v2515_v32 }
 0x9ac   :  { %v2528_v9 = vsel %vm2524_vm11, %v2521_v51, -inf }
 0x9ad   :  { %v2525_v41 = vsel %vm2524_vm11, %v2516_v60, -inf }
 0x9ae   :  { %2526 = vmax.xlane.f32.xlu1 %v2525_v41 }
 0x9b2   :  { %2529 = vmax.xlane.f32.xlu1 %v2528_v9 }
 0xa3b   :  { %v2527_v4 = vpop.xlane.xlu1 %2526 }
 0xa3c   :  { %v2531_v27 = vsub.f32 %v2516_v60, %v2527_v4 }
 0xa3e   :  { %v2533_v54 = vmul.f32 1.442695, %v2531_v27 }
 0xa3f   :  { %v2530_v31 = vpop.xlane.xlu1 %2529 }
 0xa40   :  { %2723 = vpow2.f32 %v2533_v54  ;;  %v2532_v33 = vsub.f32 %v2521_v51, %v2530_v31 }
 0xa42   :  { %v2535_v37 = vmul.f32 1.442695, %v2532_v33 }
 0xa44   :  { %2725 = vpow2.f32 %v2535_v37 }
 0xa4a   :  { %v2724_v8 = vpop.eup %2723 }
 0xa4b   :  { %v2537_v28 = vsel %vm2524_vm11, %v2724_v8, 0.0 }
 0xa4c   :  { %2538 = vadd.xlane.f32.xlu1 %v2537_v28 }
 0xa4e   :  { %v2726_v50 = vpop.eup %2725 }
 0xa4f   :  { %v2540_v53 = vsel %vm2524_vm11, %v2726_v50, 0.0 }
 0xa50   :  { %2541 = vadd.xlane.f32.xlu1 %v2540_v53 }
 0xad9   :  { %v2539_v3 = vpop.xlane.xlu1 %2538 }
 0xada   :  { %2727 = vrcp.f32 %v2539_v3 }
 0xadd   :  { %v2542_v42 = vpop.xlane.xlu1 %2541 }
 0xade   :  { %2729 = vrcp.f32 %v2542_v42 }
 0xae4   :  { %v2728_v6 = vpop.eup %2727 }
 0xae5   :  { %v2544_v38 = vmul.f32 %v2728_v6, %v2724_v8 }
 0xae7   :  { %2547 = vst.msk [vmem:[%s4100_s12] sm:$0xff] %vm2524_vm11, %v2544_v38 }
 0xae8   :  { %v2730_v39 = vpop.eup %2729 }
 0xae9   :  { %v2546_v19 = vmul.f32 %v2730_v39, %v2726_v50 }
 0xaeb   :  { %2548 = vst.msk [vmem:[%s4100_s12 + $0x8] sm:$0xff] %vm2524_vm11, %v2546_v19 }

</bundles_post_ra>
